<compile_context>
chip_gen: v5e
topology: v5e:2x2
jax: 0.10.0
libtpu: 0.0.40
codegen_flags: <defaults>
</compile_context>

<pallas_src>
import jax
import jax.numpy as jnp
from jax.experimental import pallas as pl
from jax.experimental.pallas import tpu as pltpu


def _elu(x):
    # keep as a select (not mask-multiply) so the discarded exp(inf) branch stays benign
    return jnp.where(x > 0, x, jnp.exp(x) - 1.0)


def _make_kernel(n, num_classes):
    W2 = n // 2                 # spatial width after pool1 (= conv2 spatial width)
    W3 = n // 4                 # spatial width after pool2
    Q1 = W2 * W2                # pool1 output rows / conv2 output rows
    PAD = ((W2 + 1 + 7) // 8) * 8   # zero rows above/below the flattened conv2 input

    def kernel(p1_ref, w1_ref, b1_ref, w2_ref, b2_ref,
               wf1_ref, bf1_ref, wf2_ref, bf2_ref, out_ref, zp_ref):
        f32 = jnp.float32
        bf16 = jnp.bfloat16

        # ---------------- conv1: im2col matmul (MXU, bf16 x bf16 -> f32) + bias --------
        c1 = jnp.dot(p1_ref[0], w1_ref[...], preferred_element_type=f32) + b1_ref[...]

        # ---------------- pool1: rows were permuted to ((h%2)*2+(w%2), h//2, w//2) -----
        z1 = jnp.maximum(jnp.maximum(c1[0:Q1], c1[Q1:2 * Q1]),
                         jnp.maximum(c1[2 * Q1:3 * Q1], c1[3 * Q1:4 * Q1]))   # (Q1, 32)

        # ------------- stage pooled map into a zero-padded, row-flattened scratch ------
        zp_ref[...] = jnp.zeros_like(zp_ref)
        zp_ref[PAD:PAD + Q1, :] = z1

        # column-edge masks: a flattened row shift of +-1 aliases across spatial rows,
        # so dw=0 / dw=2 taps must see zero at the first / last output column.
        wcol = jax.lax.broadcasted_iota(jnp.int32, (Q1, 1), 0)
        wcol = (wcol & (W2 - 1)) if (W2 & (W2 - 1)) == 0 else (wcol % W2)
        not_left = wcol > 0
        not_right = wcol < (W2 - 1)

        # ---------------- conv2: 9 shifted tap-dots accumulated in f32 -----------------
        acc2 = jnp.zeros((Q1, 64), f32)
        for dh in range(3):
            for dw in range(3):
                off = PAD + (dh - 1) * W2 + (dw - 1)
                xs = zp_ref[off:off + Q1, :]
                if dw == 0:
                    xs = jnp.where(not_left, xs, 0.0)
                elif dw == 2:
                    xs = jnp.where(not_right, xs, 0.0)
                acc2 = acc2 + jnp.dot(xs.astype(bf16), w2_ref[dh * 3 + dw],
                                      preferred_element_type=f32)
        acc2 = acc2 + b2_ref[...]                     # (Q1, 64), rows = h*W2 + w

        # ---------------- pool2 + ELU + FC1 (fused per spatial position) ---------------
        h1 = jnp.zeros((1, 128), f32)
        for i in range(W3):
            for j in range(W3):
                r0 = 2 * i * W2 + 2 * j
                v = jnp.maximum(
                    jnp.maximum(acc2[r0:r0 + 1, :], acc2[r0 + 1:r0 + 2, :]),
                    jnp.maximum(acc2[r0 + W2:r0 + W2 + 1, :],
                                acc2[r0 + W2 + 1:r0 + W2 + 2, :]))
                v = _elu(v)                           # ELU comes after pool2 in the spec
                h1 = h1 + jnp.dot(v.astype(bf16), wf1_ref[i * W3 + j],
                                  preferred_element_type=f32)
        h1 = _elu(h1 + bf1_ref[...])

        # ---------------- FC2 + softmax over the class dimension -----------------------
        logits = jnp.dot(h1.astype(bf16), wf2_ref[...],
                         preferred_element_type=f32) + bf2_ref[...]
        m = jnp.max(logits, axis=-1, keepdims=True)
        e = jnp.exp(logits - m)
        s = jnp.sum(e, axis=-1, keepdims=True)
        out_ref[0] = e * pl.reciprocal(s, approx=True)

    return kernel, PAD, Q1


def init_params(key, n, num_classes):
    """PyTorch-layout-equivalent parameters (conv HWIO, fc as (in, out))."""
    ks = jax.random.split(key, 8)
    f_in = (n // 4) ** 2 * 64
    return {
        "w_conv1": 0.30 * jax.random.normal(ks[0], (3, 3, 1, 32), jnp.float32),
        "b_conv1": 0.05 * jax.random.normal(ks[1], (32,), jnp.float32),
        "w_conv2": 0.06 * jax.random.normal(ks[2], (3, 3, 32, 64), jnp.float32),
        "b_conv2": 0.05 * jax.random.normal(ks[3], (64,), jnp.float32),
        "w_fc1": 0.03 * jax.random.normal(ks[4], (f_in, 128), jnp.float32),
        "b_fc1": 0.05 * jax.random.normal(ks[5], (128,), jnp.float32),
        "w_fc2": 0.09 * jax.random.normal(ks[6], (128, num_classes), jnp.float32),
        "b_fc2": 0.05 * jax.random.normal(ks[7], (num_classes,), jnp.float32),
    }


def prepare_params(params, n):
    """One-time re-layout: conv weights -> (tap, cin, cout); bake PyTorch's NCHW flatten
    order into FC1 as (spatial, cin, out); cast matmul weights to bf16 (biases stay f32)."""
    S = (n // 4) ** 2
    nc = params["w_fc2"].shape[1]
    return {
        "w1": params["w_conv1"].reshape(9, 32).astype(jnp.bfloat16),
        "b1": params["b_conv1"].reshape(1, 32).astype(jnp.float32),
        "w2": params["w_conv2"].reshape(9, 32, 64).astype(jnp.bfloat16),
        "b2": params["b_conv2"].reshape(1, 64).astype(jnp.float32),
        "wf1": params["w_fc1"].reshape(64, S, 128).transpose(1, 0, 2).astype(jnp.bfloat16),
        "bf1": params["b_fc1"].reshape(1, 128).astype(jnp.float32),
        "wf2": params["w_fc2"].astype(jnp.bfloat16),
        "bf2": params["b_fc2"].reshape(1, nc).astype(jnp.float32),
    }


def cnn_forward(x_nchw, prep):
    B = x_nchw.shape[0]
    n = x_nchw.shape[2]
    num_classes = prep["wf2"].shape[1]
    W2, W3 = n // 2, n // 4
    Q1 = W2 * W2

    # conv1 im2col (Cin=1 -> only 9*n*n values/image), rows permuted so the in-kernel
    # 2x2 max-pool is a max over 4 contiguous row blocks.
    x = x_nchw[:, 0, :, :].astype(jnp.float32)                       # (B, n, n)
    xp = jnp.pad(x, ((0, 0), (1, 1), (1, 1)))
    taps = [xp[:, dh:dh + n, dw:dw + n] for dh in range(3) for dw in range(3)]
    p1 = jnp.stack(taps, axis=-1)                                    # (B, n, n, 9)
    p1 = p1.reshape(B, W2, 2, W2, 2, 9).transpose(0, 2, 4, 1, 3, 5)
    p1 = p1.reshape(B, n * n, 9).astype(jnp.bfloat16)

    kernel, PAD, _ = _make_kernel(n, num_classes)

    out = pl.pallas_call(
        kernel,
        out_shape=jax.ShapeDtypeStruct((B, 1, num_classes), jnp.float32),
        grid=(B,),
        in_specs=[
            pl.BlockSpec((1, n * n, 9), lambda b: (b, 0, 0)),         # conv1 patches
            pl.BlockSpec((9, 32), lambda b: (0, 0)),                  # w_conv1
            pl.BlockSpec((1, 32), lambda b: (0, 0)),                  # b_conv1
            pl.BlockSpec((9, 32, 64), lambda b: (0, 0, 0)),           # w_conv2 (tap,ci,co)
            pl.BlockSpec((1, 64), lambda b: (0, 0)),                  # b_conv2
            pl.BlockSpec((W3 * W3, 64, 128), lambda b: (0, 0, 0)),    # w_fc1 (s, c, f)
            pl.BlockSpec((1, 128), lambda b: (0, 0)),                 # b_fc1
            pl.BlockSpec((128, num_classes), lambda b: (0, 0)),       # w_fc2
            pl.BlockSpec((1, num_classes), lambda b: (0, 0)),         # b_fc2
        ],
        out_specs=pl.BlockSpec((1, 1, num_classes), lambda b: (b, 0, 0)),
        scratch_shapes=[pltpu.VMEM((2 * PAD + Q1, 32), jnp.float32)],
        compiler_params=pltpu.CompilerParams(dimension_semantics=("parallel",)),
    )(p1, prep["w1"], prep["b1"], prep["w2"], prep["b2"],
      prep["wf1"], prep["bf1"], prep["wf2"], prep["bf2"])
    return out[:, 0, :]


if __name__ == "__main__":
    n, num_classes, batch = 16, 10, 2
    key = jax.random.PRNGKey(0)
    k_x, k_p = jax.random.split(key)
    x = jax.random.normal(k_x, (batch, 1, n, n), jnp.float32)        # NCHW like PyTorch
    params = init_params(k_p, n, num_classes)
    prep = prepare_params(params, n)                                  # one-time re-layout

    fwd = jax.jit(cnn_forward)
    out = jax.block_until_ready(fwd(x, prep))

    assert out.shape == (batch, num_classes)
    assert bool(jnp.all(jnp.isfinite(out)))
    print("KERNEL_OK")
</pallas_src>

<mosaic_0001>
module attributes {stable_mosaic.version = 11 : i64} {
  func.func @kernel(%arg0: i32, %arg1: memref<1x256x9xbf16, #tpu.memory_space<vmem>>, %arg2: memref<9x32xbf16, #tpu.memory_space<vmem>>, %arg3: memref<1x32xf32, #tpu.memory_space<vmem>>, %arg4: memref<9x32x64xbf16, #tpu.memory_space<vmem>>, %arg5: memref<1x64xf32, #tpu.memory_space<vmem>>, %arg6: memref<16x64x128xbf16, #tpu.memory_space<vmem>>, %arg7: memref<1x128xf32, #tpu.memory_space<vmem>>, %arg8: memref<128x10xbf16, #tpu.memory_space<vmem>>, %arg9: memref<1x10xf32, #tpu.memory_space<vmem>>, %arg10: memref<1x1x10xf32, #tpu.memory_space<vmem>>, %arg11: memref<96x32xf32, #tpu.memory_space<vmem>>) attributes {dimension_semantics = [#tpu.dimension_semantics<parallel>], iteration_bounds = array<i64: 2>, scalar_prefetch = 0 : i64, scratch_operands = 1 : i64, tpu.core_type = #tpu.core_type<tc>, window_params = [{transform_indices = @transform_0, window_bounds = array<i64: 1, 256, 9>}, {pipeline_mode = #tpu.pipeline_mode<synchronous>, transform_indices = @transform_1, window_bounds = array<i64: 9, 32>}, {pipeline_mode = #tpu.pipeline_mode<synchronous>, transform_indices = @transform_2, window_bounds = array<i64: 1, 32>}, {pipeline_mode = #tpu.pipeline_mode<synchronous>, transform_indices = @transform_3, window_bounds = array<i64: 9, 32, 64>}, {pipeline_mode = #tpu.pipeline_mode<synchronous>, transform_indices = @transform_4, window_bounds = array<i64: 1, 64>}, {pipeline_mode = #tpu.pipeline_mode<synchronous>, transform_indices = @transform_5, window_bounds = array<i64: 16, 64, 128>}, {pipeline_mode = #tpu.pipeline_mode<synchronous>, transform_indices = @transform_6, window_bounds = array<i64: 1, 128>}, {pipeline_mode = #tpu.pipeline_mode<synchronous>, transform_indices = @transform_7, window_bounds = array<i64: 128, 10>}, {pipeline_mode = #tpu.pipeline_mode<synchronous>, transform_indices = @transform_8, window_bounds = array<i64: 1, 10>}, {transform_indices = @transform_9, window_bounds = array<i64: 1, 1, 10>}]} {
    %c0 = arith.constant 0 : index
    %c0_0 = arith.constant 0 : index
    %c0_1 = arith.constant 0 : index
    %0 = vector.load %arg1[%c0, %c0_0, %c0_1] : memref<1x256x9xbf16, #tpu.memory_space<vmem>>, vector<1x256x9xbf16>
    %1 = vector.shape_cast %0 : vector<1x256x9xbf16> to vector<256x9xbf16>
    %c0_2 = arith.constant 0 : index
    %c0_3 = arith.constant 0 : index
    %2 = vector.load %arg2[%c0_2, %c0_3] : memref<9x32xbf16, #tpu.memory_space<vmem>>, vector<9x32xbf16>
    %cst = arith.constant dense<0.000000e+00> : vector<256x32xf32>
    %3 = tpu.matmul %1, %2, %cst {dimension_numbers = #tpu.dot_dimension_numbers<[1], [0], [0], [1], [0, 0, 1, 1], [], []>} : vector<256x9xbf16>, vector<9x32xbf16>, vector<256x32xf32> -> vector<256x32xf32>
    %c0_4 = arith.constant 0 : index
    %c0_5 = arith.constant 0 : index
    %4 = vector.load %arg3[%c0_4, %c0_5] : memref<1x32xf32, #tpu.memory_space<vmem>>, vector<1x32xf32>
    %5 = vector.broadcast %4 : vector<1x32xf32> to vector<256x32xf32>
    %6 = arith.addf %3, %5 : vector<256x32xf32>
    %7 = vector.extract_strided_slice %6 {offsets = [0, 0], sizes = [64, 32], strides = [1, 1]} : vector<256x32xf32> to vector<64x32xf32>
    %8 = vector.extract_strided_slice %6 {offsets = [64, 0], sizes = [64, 32], strides = [1, 1]} : vector<256x32xf32> to vector<64x32xf32>
    %9 = arith.maximumf %7, %8 : vector<64x32xf32>
    %10 = vector.extract_strided_slice %6 {offsets = [128, 0], sizes = [64, 32], strides = [1, 1]} : vector<256x32xf32> to vector<64x32xf32>
    %11 = vector.extract_strided_slice %6 {offsets = [192, 0], sizes = [64, 32], strides = [1, 1]} : vector<256x32xf32> to vector<64x32xf32>
    %12 = arith.maximumf %10, %11 : vector<64x32xf32>
    %13 = arith.maximumf %9, %12 : vector<64x32xf32>
    %cst_6 = arith.constant 0.000000e+00 : f32
    %14 = vector.broadcast %cst_6 : f32 to vector<96x32xf32>
    %c0_7 = arith.constant 0 : index
    %c0_8 = arith.constant 0 : index
    %15 = vector.load %arg11[%c0_7, %c0_8] : memref<96x32xf32, #tpu.memory_space<vmem>>, vector<96x32xf32>
    tpu.vector_store %arg11[%c0_7, %c0_8], %14 {strides = array<i32>} : memref<96x32xf32, #tpu.memory_space<vmem>>, vector<96x32xf32>,
    %c16 = arith.constant 16 : index
    %c0_9 = arith.constant 0 : index
    %16 = vector.load %arg11[%c16, %c0_9] : memref<96x32xf32, #tpu.memory_space<vmem>>, vector<64x32xf32>
    tpu.vector_store %arg11[%c16, %c0_9], %13 {strides = array<i32>} : memref<96x32xf32, #tpu.memory_space<vmem>>, vector<64x32xf32>,
    %17 = tpu.iota {dimensions = array<i32: 0>} : vector<64x1xi32>
    %c7_i32 = arith.constant 7 : i32
    %18 = vector.broadcast %c7_i32 : i32 to vector<64x1xi32>
    %19 = arith.andi %17, %18 : vector<64x1xi32>
    %c0_i32 = arith.constant 0 : i32
    %20 = vector.broadcast %c0_i32 : i32 to vector<64x1xi32>
    %21 = arith.cmpi sgt, %19, %20 : vector<64x1xi32>
    %c7_i32_10 = arith.constant 7 : i32
    %22 = vector.broadcast %c7_i32_10 : i32 to vector<64x1xi32>
    %23 = arith.cmpi slt, %19, %22 : vector<64x1xi32>
    %cst_11 = arith.constant 0.000000e+00 : f32
    %24 = vector.broadcast %cst_11 : f32 to vector<64x64xf32>
    %c7 = arith.constant 7 : index
    %c0_12 = arith.constant 0 : index
    %25 = vector.load %arg11[%c7, %c0_12] : memref<96x32xf32, #tpu.memory_space<vmem>>, vector<64x32xf32>
    %cst_13 = arith.constant 0.000000e+00 : f32
    %26 = vector.shape_cast %21 : vector<64x1xi1> to vector<64x1xi1>
    %27 = vector.broadcast %26 : vector<64x1xi1> to vector<64x32xi1>
    %28 = vector.broadcast %cst_13 : f32 to vector<64x32xf32>
    %29 = arith.select %27, %25, %28 : vector<64x32xi1>, vector<64x32xf32>
    %30 = arith.truncf %29 : vector<64x32xf32> to vector<64x32xbf16>
    %c0_14 = arith.constant 0 : index
    %c0_15 = arith.constant 0 : index
    %c0_16 = arith.constant 0 : index
    %31 = vector.load %arg4[%c0_14, %c0_15, %c0_16] : memref<9x32x64xbf16, #tpu.memory_space<vmem>>, vector<1x32x64xbf16>
    %32 = vector.shape_cast %31 : vector<1x32x64xbf16> to vector<32x64xbf16>
    %cst_17 = arith.constant dense<0.000000e+00> : vector<64x64xf32>
    %33 = tpu.matmul %30, %32, %cst_17 {dimension_numbers = #tpu.dot_dimension_numbers<[1], [0], [0], [1], [0, 0, 1, 1], [], []>} : vector<64x32xbf16>, vector<32x64xbf16>, vector<64x64xf32> -> vector<64x64xf32>
    %34 = arith.addf %24, %33 : vector<64x64xf32>
    %c8 = arith.constant 8 : index
    %c0_18 = arith.constant 0 : index
    %35 = vector.load %arg11[%c8, %c0_18] : memref<96x32xf32, #tpu.memory_space<vmem>>, vector<64x32xf32>
    %36 = arith.truncf %35 : vector<64x32xf32> to vector<64x32xbf16>
    %c1 = arith.constant 1 : index
    %c0_19 = arith.constant 0 : index
    %c0_20 = arith.constant 0 : index
    %37 = vector.load %arg4[%c1, %c0_19, %c0_20] : memref<9x32x64xbf16, #tpu.memory_space<vmem>>, vector<1x32x64xbf16>
    %38 = vector.shape_cast %37 : vector<1x32x64xbf16> to vector<32x64xbf16>
    %cst_21 = arith.constant dense<0.000000e+00> : vector<64x64xf32>
    %39 = tpu.matmul %36, %38, %cst_21 {dimension_numbers = #tpu.dot_dimension_numbers<[1], [0], [0], [1], [0, 0, 1, 1], [], []>} : vector<64x32xbf16>, vector<32x64xbf16>, vector<64x64xf32> -> vector<64x64xf32>
    %40 = arith.addf %34, %39 : vector<64x64xf32>
    %c9 = arith.constant 9 : index
    %c0_22 = arith.constant 0 : index
    %41 = vector.load %arg11[%c9, %c0_22] : memref<96x32xf32, #tpu.memory_space<vmem>>, vector<64x32xf32>
    %cst_23 = arith.constant 0.000000e+00 : f32
    %42 = vector.shape_cast %23 : vector<64x1xi1> to vector<64x1xi1>
    %43 = vector.broadcast %42 : vector<64x1xi1> to vector<64x32xi1>
    %44 = vector.broadcast %cst_23 : f32 to vector<64x32xf32>
    %45 = arith.select %43, %41, %44 : vector<64x32xi1>, vector<64x32xf32>
    %46 = arith.truncf %45 : vector<64x32xf32> to vector<64x32xbf16>
    %c2 = arith.constant 2 : index
    %c0_24 = arith.constant 0 : index
    %c0_25 = arith.constant 0 : index
    %47 = vector.load %arg4[%c2, %c0_24, %c0_25] : memref<9x32x64xbf16, #tpu.memory_space<vmem>>, vector<1x32x64xbf16>
    %48 = vector.shape_cast %47 : vector<1x32x64xbf16> to vector<32x64xbf16>
    %cst_26 = arith.constant dense<0.000000e+00> : vector<64x64xf32>
    %49 = tpu.matmul %46, %48, %cst_26 {dimension_numbers = #tpu.dot_dimension_numbers<[1], [0], [0], [1], [0, 0, 1, 1], [], []>} : vector<64x32xbf16>, vector<32x64xbf16>, vector<64x64xf32> -> vector<64x64xf32>
    %50 = arith.addf %40, %49 : vector<64x64xf32>
    %c15 = arith.constant 15 : index
    %c0_27 = arith.constant 0 : index
    %51 = vector.load %arg11[%c15, %c0_27] : memref<96x32xf32, #tpu.memory_space<vmem>>, vector<64x32xf32>
    %cst_28 = arith.constant 0.000000e+00 : f32
    %52 = vector.shape_cast %21 : vector<64x1xi1> to vector<64x1xi1>
    %53 = vector.broadcast %52 : vector<64x1xi1> to vector<64x32xi1>
    %54 = vector.broadcast %cst_28 : f32 to vector<64x32xf32>
    %55 = arith.select %53, %51, %54 : vector<64x32xi1>, vector<64x32xf32>
    %56 = arith.truncf %55 : vector<64x32xf32> to vector<64x32xbf16>
    %c3 = arith.constant 3 : index
    %c0_29 = arith.constant 0 : index
    %c0_30 = arith.constant 0 : index
    %57 = vector.load %arg4[%c3, %c0_29, %c0_30] : memref<9x32x64xbf16, #tpu.memory_space<vmem>>, vector<1x32x64xbf16>
    %58 = vector.shape_cast %57 : vector<1x32x64xbf16> to vector<32x64xbf16>
    %cst_31 = arith.constant dense<0.000000e+00> : vector<64x64xf32>
    %59 = tpu.matmul %56, %58, %cst_31 {dimension_numbers = #tpu.dot_dimension_numbers<[1], [0], [0], [1], [0, 0, 1, 1], [], []>} : vector<64x32xbf16>, vector<32x64xbf16>, vector<64x64xf32> -> vector<64x64xf32>
    %60 = arith.addf %50, %59 : vector<64x64xf32>
    %c16_32 = arith.constant 16 : index
    %c0_33 = arith.constant 0 : index
    %61 = vector.load %arg11[%c16_32, %c0_33] : memref<96x32xf32, #tpu.memory_space<vmem>>, vector<64x32xf32>
    %62 = arith.truncf %61 : vector<64x32xf32> to vector<64x32xbf16>
    %c4 = arith.constant 4 : index
    %c0_34 = arith.constant 0 : index
    %c0_35 = arith.constant 0 : index
    %63 = vector.load %arg4[%c4, %c0_34, %c0_35] : memref<9x32x64xbf16, #tpu.memory_space<vmem>>, vector<1x32x64xbf16>
    %64 = vector.shape_cast %63 : vector<1x32x64xbf16> to vector<32x64xbf16>
    %cst_36 = arith.constant dense<0.000000e+00> : vector<64x64xf32>
    %65 = tpu.matmul %62, %64, %cst_36 {dimension_numbers = #tpu.dot_dimension_numbers<[1], [0], [0], [1], [0, 0, 1, 1], [], []>} : vector<64x32xbf16>, vector<32x64xbf16>, vector<64x64xf32> -> vector<64x64xf32>
    %66 = arith.addf %60, %65 : vector<64x64xf32>
    %c17 = arith.constant 17 : index
    %c0_37 = arith.constant 0 : index
    %67 = vector.load %arg11[%c17, %c0_37] : memref<96x32xf32, #tpu.memory_space<vmem>>, vector<64x32xf32>
    %cst_38 = arith.constant 0.000000e+00 : f32
    %68 = vector.shape_cast %23 : vector<64x1xi1> to vector<64x1xi1>
    %69 = vector.broadcast %68 : vector<64x1xi1> to vector<64x32xi1>
    %70 = vector.broadcast %cst_38 : f32 to vector<64x32xf32>
    %71 = arith.select %69, %67, %70 : vector<64x32xi1>, vector<64x32xf32>
    %72 = arith.truncf %71 : vector<64x32xf32> to vector<64x32xbf16>
    %c5 = arith.constant 5 : index
    %c0_39 = arith.constant 0 : index
    %c0_40 = arith.constant 0 : index
    %73 = vector.load %arg4[%c5, %c0_39, %c0_40] : memref<9x32x64xbf16, #tpu.memory_space<vmem>>, vector<1x32x64xbf16>
    %74 = vector.shape_cast %73 : vector<1x32x64xbf16> to vector<32x64xbf16>
    %cst_41 = arith.constant dense<0.000000e+00> : vector<64x64xf32>
    %75 = tpu.matmul %72, %74, %cst_41 {dimension_numbers = #tpu.dot_dimension_numbers<[1], [0], [0], [1], [0, 0, 1, 1], [], []>} : vector<64x32xbf16>, vector<32x64xbf16>, vector<64x64xf32> -> vector<64x64xf32>
    %76 = arith.addf %66, %75 : vector<64x64xf32>
    %c23 = arith.constant 23 : index
    %c0_42 = arith.constant 0 : index
    %77 = vector.load %arg11[%c23, %c0_42] : memref<96x32xf32, #tpu.memory_space<vmem>>, vector<64x32xf32>
    %cst_43 = arith.constant 0.000000e+00 : f32
    %78 = vector.shape_cast %21 : vector<64x1xi1> to vector<64x1xi1>
    %79 = vector.broadcast %78 : vector<64x1xi1> to vector<64x32xi1>
    %80 = vector.broadcast %cst_43 : f32 to vector<64x32xf32>
    %81 = arith.select %79, %77, %80 : vector<64x32xi1>, vector<64x32xf32>
    %82 = arith.truncf %81 : vector<64x32xf32> to vector<64x32xbf16>
    %c6 = arith.constant 6 : index
    %c0_44 = arith.constant 0 : index
    %c0_45 = arith.constant 0 : index
    %83 = vector.load %arg4[%c6, %c0_44, %c0_45] : memref<9x32x64xbf16, #tpu.memory_space<vmem>>, vector<1x32x64xbf16>
    %84 = vector.shape_cast %83 : vector<1x32x64xbf16> to vector<32x64xbf16>
    %cst_46 = arith.constant dense<0.000000e+00> : vector<64x64xf32>
    %85 = tpu.matmul %82, %84, %cst_46 {dimension_numbers = #tpu.dot_dimension_numbers<[1], [0], [0], [1], [0, 0, 1, 1], [], []>} : vector<64x32xbf16>, vector<32x64xbf16>, vector<64x64xf32> -> vector<64x64xf32>
    %86 = arith.addf %76, %85 : vector<64x64xf32>
    %c24 = arith.constant 24 : index
    %c0_47 = arith.constant 0 : index
    %87 = vector.load %arg11[%c24, %c0_47] : memref<96x32xf32, #tpu.memory_space<vmem>>, vector<64x32xf32>
    %88 = arith.truncf %87 : vector<64x32xf32> to vector<64x32xbf16>
    %c7_48 = arith.constant 7 : index
    %c0_49 = arith.constant 0 : index
    %c0_50 = arith.constant 0 : index
    %89 = vector.load %arg4[%c7_48, %c0_49, %c0_50] : memref<9x32x64xbf16, #tpu.memory_space<vmem>>, vector<1x32x64xbf16>
    %90 = vector.shape_cast %89 : vector<1x32x64xbf16> to vector<32x64xbf16>
    %cst_51 = arith.constant dense<0.000000e+00> : vector<64x64xf32>
    %91 = tpu.matmul %88, %90, %cst_51 {dimension_numbers = #tpu.dot_dimension_numbers<[1], [0], [0], [1], [0, 0, 1, 1], [], []>} : vector<64x32xbf16>, vector<32x64xbf16>, vector<64x64xf32> -> vector<64x64xf32>
    %92 = arith.addf %86, %91 : vector<64x64xf32>
    %c25 = arith.constant 25 : index
    %c0_52 = arith.constant 0 : index
    %93 = vector.load %arg11[%c25, %c0_52] : memref<96x32xf32, #tpu.memory_space<vmem>>, vector<64x32xf32>
    %cst_53 = arith.constant 0.000000e+00 : f32
    %94 = vector.shape_cast %23 : vector<64x1xi1> to vector<64x1xi1>
    %95 = vector.broadcast %94 : vector<64x1xi1> to vector<64x32xi1>
    %96 = vector.broadcast %cst_53 : f32 to vector<64x32xf32>
    %97 = arith.select %95, %93, %96 : vector<64x32xi1>, vector<64x32xf32>
    %98 = arith.truncf %97 : vector<64x32xf32> to vector<64x32xbf16>
    %c8_54 = arith.constant 8 : index
    %c0_55 = arith.constant 0 : index
    %c0_56 = arith.constant 0 : index
    %99 = vector.load %arg4[%c8_54, %c0_55, %c0_56] : memref<9x32x64xbf16, #tpu.memory_space<vmem>>, vector<1x32x64xbf16>
    %100 = vector.shape_cast %99 : vector<1x32x64xbf16> to vector<32x64xbf16>
    %cst_57 = arith.constant dense<0.000000e+00> : vector<64x64xf32>
    %101 = tpu.matmul %98, %100, %cst_57 {dimension_numbers = #tpu.dot_dimension_numbers<[1], [0], [0], [1], [0, 0, 1, 1], [], []>} : vector<64x32xbf16>, vector<32x64xbf16>, vector<64x64xf32> -> vector<64x64xf32>
    %102 = arith.addf %92, %101 : vector<64x64xf32>
    %c0_58 = arith.constant 0 : index
    %c0_59 = arith.constant 0 : index
    %103 = vector.load %arg5[%c0_58, %c0_59] : memref<1x64xf32, #tpu.memory_space<vmem>>, vector<1x64xf32>
    %104 = vector.broadcast %103 : vector<1x64xf32> to vector<64x64xf32>
    %105 = arith.addf %102, %104 : vector<64x64xf32>
    %cst_60 = arith.constant 0.000000e+00 : f32
    %106 = vector.broadcast %cst_60 : f32 to vector<1x128xf32>
    %107 = vector.extract_strided_slice %105 {offsets = [0, 0], sizes = [1, 64], strides = [1, 1]} : vector<64x64xf32> to vector<1x64xf32>
    %108 = vector.extract_strided_slice %105 {offsets = [1, 0], sizes = [1, 64], strides = [1, 1]} : vector<64x64xf32> to vector<1x64xf32>
    %109 = arith.maximumf %107, %108 : vector<1x64xf32>
    %110 = vector.extract_strided_slice %105 {offsets = [8, 0], sizes = [1, 64], strides = [1, 1]} : vector<64x64xf32> to vector<1x64xf32>
    %111 = vector.extract_strided_slice %105 {offsets = [9, 0], sizes = [1, 64], strides = [1, 1]} : vector<64x64xf32> to vector<1x64xf32>
    %112 = arith.maximumf %110, %111 : vector<1x64xf32>
    %113 = arith.maximumf %109, %112 : vector<1x64xf32>
    %cst_61 = arith.constant 0.000000e+00 : f32
    %114 = vector.broadcast %cst_61 : f32 to vector<1x64xf32>
    %115 = arith.cmpf ogt, %113, %114 : vector<1x64xf32>
    %116 = math.exp %113 : vector<1x64xf32>
    %cst_62 = arith.constant 1.000000e+00 : f32
    %117 = vector.broadcast %cst_62 : f32 to vector<1x64xf32>
    %118 = arith.subf %116, %117 : vector<1x64xf32>
    %119 = arith.select %115, %113, %118 : vector<1x64xi1>, vector<1x64xf32>
    %120 = arith.truncf %119 : vector<1x64xf32> to vector<1x64xbf16>
    %c0_63 = arith.constant 0 : index
    %c0_64 = arith.constant 0 : index
    %c0_65 = arith.constant 0 : index
    %121 = vector.load %arg6[%c0_63, %c0_64, %c0_65] : memref<16x64x128xbf16, #tpu.memory_space<vmem>>, vector<1x64x128xbf16>
    %122 = vector.shape_cast %121 : vector<1x64x128xbf16> to vector<64x128xbf16>
    %cst_66 = arith.constant dense<0.000000e+00> : vector<1x128xf32>
    %123 = tpu.matmul %120, %122, %cst_66 {dimension_numbers = #tpu.dot_dimension_numbers<[1], [0], [0], [1], [0, 0, 1, 1], [], []>} : vector<1x64xbf16>, vector<64x128xbf16>, vector<1x128xf32> -> vector<1x128xf32>
    %124 = arith.addf %106, %123 : vector<1x128xf32>
    %125 = vector.extract_strided_slice %105 {offsets = [2, 0], sizes = [1, 64], strides = [1, 1]} : vector<64x64xf32> to vector<1x64xf32>
    %126 = vector.extract_strided_slice %105 {offsets = [3, 0], sizes = [1, 64], strides = [1, 1]} : vector<64x64xf32> to vector<1x64xf32>
    %127 = arith.maximumf %125, %126 : vector<1x64xf32>
    %128 = vector.extract_strided_slice %105 {offsets = [10, 0], sizes = [1, 64], strides = [1, 1]} : vector<64x64xf32> to vector<1x64xf32>
    %129 = vector.extract_strided_slice %105 {offsets = [11, 0], sizes = [1, 64], strides = [1, 1]} : vector<64x64xf32> to vector<1x64xf32>
    %130 = arith.maximumf %128, %129 : vector<1x64xf32>
    %131 = arith.maximumf %127, %130 : vector<1x64xf32>
    %cst_67 = arith.constant 0.000000e+00 : f32
    %132 = vector.broadcast %cst_67 : f32 to vector<1x64xf32>
    %133 = arith.cmpf ogt, %131, %132 : vector<1x64xf32>
    %134 = math.exp %131 : vector<1x64xf32>
    %cst_68 = arith.constant 1.000000e+00 : f32
    %135 = vector.broadcast %cst_68 : f32 to vector<1x64xf32>
    %136 = arith.subf %134, %135 : vector<1x64xf32>
    %137 = arith.select %133, %131, %136 : vector<1x64xi1>, vector<1x64xf32>
    %138 = arith.truncf %137 : vector<1x64xf32> to vector<1x64xbf16>
    %c1_69 = arith.constant 1 : index
    %c0_70 = arith.constant 0 : index
    %c0_71 = arith.constant 0 : index
    %139 = vector.load %arg6[%c1_69, %c0_70, %c0_71] : memref<16x64x128xbf16, #tpu.memory_space<vmem>>, vector<1x64x128xbf16>
    %140 = vector.shape_cast %139 : vector<1x64x128xbf16> to vector<64x128xbf16>
    %cst_72 = arith.constant dense<0.000000e+00> : vector<1x128xf32>
    %141 = tpu.matmul %138, %140, %cst_72 {dimension_numbers = #tpu.dot_dimension_numbers<[1], [0], [0], [1], [0, 0, 1, 1], [], []>} : vector<1x64xbf16>, vector<64x128xbf16>, vector<1x128xf32> -> vector<1x128xf32>
    %142 = arith.addf %124, %141 : vector<1x128xf32>
    %143 = vector.extract_strided_slice %105 {offsets = [4, 0], sizes = [1, 64], strides = [1, 1]} : vector<64x64xf32> to vector<1x64xf32>
    %144 = vector.extract_strided_slice %105 {offsets = [5, 0], sizes = [1, 64], strides = [1, 1]} : vector<64x64xf32> to vector<1x64xf32>
    %145 = arith.maximumf %143, %144 : vector<1x64xf32>
    %146 = vector.extract_strided_slice %105 {offsets = [12, 0], sizes = [1, 64], strides = [1, 1]} : vector<64x64xf32> to vector<1x64xf32>
    %147 = vector.extract_strided_slice %105 {offsets = [13, 0], sizes = [1, 64], strides = [1, 1]} : vector<64x64xf32> to vector<1x64xf32>
    %148 = arith.maximumf %146, %147 : vector<1x64xf32>
    %149 = arith.maximumf %145, %148 : vector<1x64xf32>
    %cst_73 = arith.constant 0.000000e+00 : f32
    %150 = vector.broadcast %cst_73 : f32 to vector<1x64xf32>
    %151 = arith.cmpf ogt, %149, %150 : vector<1x64xf32>
    %152 = math.exp %149 : vector<1x64xf32>
    %cst_74 = arith.constant 1.000000e+00 : f32
    %153 = vector.broadcast %cst_74 : f32 to vector<1x64xf32>
    %154 = arith.subf %152, %153 : vector<1x64xf32>
    %155 = arith.select %151, %149, %154 : vector<1x64xi1>, vector<1x64xf32>
    %156 = arith.truncf %155 : vector<1x64xf32> to vector<1x64xbf16>
    %c2_75 = arith.constant 2 : index
    %c0_76 = arith.constant 0 : index
    %c0_77 = arith.constant 0 : index
    %157 = vector.load %arg6[%c2_75, %c0_76, %c0_77] : memref<16x64x128xbf16, #tpu.memory_space<vmem>>, vector<1x64x128xbf16>
    %158 = vector.shape_cast %157 : vector<1x64x128xbf16> to vector<64x128xbf16>
    %cst_78 = arith.constant dense<0.000000e+00> : vector<1x128xf32>
    %159 = tpu.matmul %156, %158, %cst_78 {dimension_numbers = #tpu.dot_dimension_numbers<[1], [0], [0], [1], [0, 0, 1, 1], [], []>} : vector<1x64xbf16>, vector<64x128xbf16>, vector<1x128xf32> -> vector<1x128xf32>
    %160 = arith.addf %142, %159 : vector<1x128xf32>
    %161 = vector.extract_strided_slice %105 {offsets = [6, 0], sizes = [1, 64], strides = [1, 1]} : vector<64x64xf32> to vector<1x64xf32>
    %162 = vector.extract_strided_slice %105 {offsets = [7, 0], sizes = [1, 64], strides = [1, 1]} : vector<64x64xf32> to vector<1x64xf32>
    %163 = arith.maximumf %161, %162 : vector<1x64xf32>
    %164 = vector.extract_strided_slice %105 {offsets = [14, 0], sizes = [1, 64], strides = [1, 1]} : vector<64x64xf32> to vector<1x64xf32>
    %165 = vector.extract_strided_slice %105 {offsets = [15, 0], sizes = [1, 64], strides = [1, 1]} : vector<64x64xf32> to vector<1x64xf32>
    %166 = arith.maximumf %164, %165 : vector<1x64xf32>
    %167 = arith.maximumf %163, %166 : vector<1x64xf32>
    %cst_79 = arith.constant 0.000000e+00 : f32
    %168 = vector.broadcast %cst_79 : f32 to vector<1x64xf32>
    %169 = arith.cmpf ogt, %167, %168 : vector<1x64xf32>
    %170 = math.exp %167 : vector<1x64xf32>
    %cst_80 = arith.constant 1.000000e+00 : f32
    %171 = vector.broadcast %cst_80 : f32 to vector<1x64xf32>
    %172 = arith.subf %170, %171 : vector<1x64xf32>
    %173 = arith.select %169, %167, %172 : vector<1x64xi1>, vector<1x64xf32>
    %174 = arith.truncf %173 : vector<1x64xf32> to vector<1x64xbf16>
    %c3_81 = arith.constant 3 : index
    %c0_82 = arith.constant 0 : index
    %c0_83 = arith.constant 0 : index
    %175 = vector.load %arg6[%c3_81, %c0_82, %c0_83] : memref<16x64x128xbf16, #tpu.memory_space<vmem>>, vector<1x64x128xbf16>
    %176 = vector.shape_cast %175 : vector<1x64x128xbf16> to vector<64x128xbf16>
    %cst_84 = arith.constant dense<0.000000e+00> : vector<1x128xf32>
    %177 = tpu.matmul %174, %176, %cst_84 {dimension_numbers = #tpu.dot_dimension_numbers<[1], [0], [0], [1], [0, 0, 1, 1], [], []>} : vector<1x64xbf16>, vector<64x128xbf16>, vector<1x128xf32> -> vector<1x128xf32>
    %178 = arith.addf %160, %177 : vector<1x128xf32>
    %179 = vector.extract_strided_slice %105 {offsets = [16, 0], sizes = [1, 64], strides = [1, 1]} : vector<64x64xf32> to vector<1x64xf32>
    %180 = vector.extract_strided_slice %105 {offsets = [17, 0], sizes = [1, 64], strides = [1, 1]} : vector<64x64xf32> to vector<1x64xf32>
    %181 = arith.maximumf %179, %180 : vector<1x64xf32>
    %182 = vector.extract_strided_slice %105 {offsets = [24, 0], sizes = [1, 64], strides = [1, 1]} : vector<64x64xf32> to vector<1x64xf32>
    %183 = vector.extract_strided_slice %105 {offsets = [25, 0], sizes = [1, 64], strides = [1, 1]} : vector<64x64xf32> to vector<1x64xf32>
    %184 = arith.maximumf %182, %183 : vector<1x64xf32>
    %185 = arith.maximumf %181, %184 : vector<1x64xf32>
    %cst_85 = arith.constant 0.000000e+00 : f32
    %186 = vector.broadcast %cst_85 : f32 to vector<1x64xf32>
    %187 = arith.cmpf ogt, %185, %186 : vector<1x64xf32>
    %188 = math.exp %185 : vector<1x64xf32>
    %cst_86 = arith.constant 1.000000e+00 : f32
    %189 = vector.broadcast %cst_86 : f32 to vector<1x64xf32>
    %190 = arith.subf %188, %189 : vector<1x64xf32>
    %191 = arith.select %187, %185, %190 : vector<1x64xi1>, vector<1x64xf32>
    %192 = arith.truncf %191 : vector<1x64xf32> to vector<1x64xbf16>
    %c4_87 = arith.constant 4 : index
    %c0_88 = arith.constant 0 : index
    %c0_89 = arith.constant 0 : index
    %193 = vector.load %arg6[%c4_87, %c0_88, %c0_89] : memref<16x64x128xbf16, #tpu.memory_space<vmem>>, vector<1x64x128xbf16>
    %194 = vector.shape_cast %193 : vector<1x64x128xbf16> to vector<64x128xbf16>
    %cst_90 = arith.constant dense<0.000000e+00> : vector<1x128xf32>
    %195 = tpu.matmul %192, %194, %cst_90 {dimension_numbers = #tpu.dot_dimension_numbers<[1], [0], [0], [1], [0, 0, 1, 1], [], []>} : vector<1x64xbf16>, vector<64x128xbf16>, vector<1x128xf32> -> vector<1x128xf32>
    %196 = arith.addf %178, %195 : vector<1x128xf32>
    %197 = vector.extract_strided_slice %105 {offsets = [18, 0], sizes = [1, 64], strides = [1, 1]} : vector<64x64xf32> to vector<1x64xf32>
    %198 = vector.extract_strided_slice %105 {offsets = [19, 0], sizes = [1, 64], strides = [1, 1]} : vector<64x64xf32> to vector<1x64xf32>
    %199 = arith.maximumf %197, %198 : vector<1x64xf32>
    %200 = vector.extract_strided_slice %105 {offsets = [26, 0], sizes = [1, 64], strides = [1, 1]} : vector<64x64xf32> to vector<1x64xf32>
    %201 = vector.extract_strided_slice %105 {offsets = [27, 0], sizes = [1, 64], strides = [1, 1]} : vector<64x64xf32> to vector<1x64xf32>
    %202 = arith.maximumf %200, %201 : vector<1x64xf32>
    %203 = arith.maximumf %199, %202 : vector<1x64xf32>
    %cst_91 = arith.constant 0.000000e+00 : f32
    %204 = vector.broadcast %cst_91 : f32 to vector<1x64xf32>
    %205 = arith.cmpf ogt, %203, %204 : vector<1x64xf32>
    %206 = math.exp %203 : vector<1x64xf32>
    %cst_92 = arith.constant 1.000000e+00 : f32
    %207 = vector.broadcast %cst_92 : f32 to vector<1x64xf32>
    %208 = arith.subf %206, %207 : vector<1x64xf32>
    %209 = arith.select %205, %203, %208 : vector<1x64xi1>, vector<1x64xf32>
    %210 = arith.truncf %209 : vector<1x64xf32> to vector<1x64xbf16>
    %c5_93 = arith.constant 5 : index
    %c0_94 = arith.constant 0 : index
    %c0_95 = arith.constant 0 : index
    %211 = vector.load %arg6[%c5_93, %c0_94, %c0_95] : memref<16x64x128xbf16, #tpu.memory_space<vmem>>, vector<1x64x128xbf16>
    %212 = vector.shape_cast %211 : vector<1x64x128xbf16> to vector<64x128xbf16>
    %cst_96 = arith.constant dense<0.000000e+00> : vector<1x128xf32>
    %213 = tpu.matmul %210, %212, %cst_96 {dimension_numbers = #tpu.dot_dimension_numbers<[1], [0], [0], [1], [0, 0, 1, 1], [], []>} : vector<1x64xbf16>, vector<64x128xbf16>, vector<1x128xf32> -> vector<1x128xf32>
    %214 = arith.addf %196, %213 : vector<1x128xf32>
    %215 = vector.extract_strided_slice %105 {offsets = [20, 0], sizes = [1, 64], strides = [1, 1]} : vector<64x64xf32> to vector<1x64xf32>
    %216 = vector.extract_strided_slice %105 {offsets = [21, 0], sizes = [1, 64], strides = [1, 1]} : vector<64x64xf32> to vector<1x64xf32>
    %217 = arith.maximumf %215, %216 : vector<1x64xf32>
    %218 = vector.extract_strided_slice %105 {offsets = [28, 0], sizes = [1, 64], strides = [1, 1]} : vector<64x64xf32> to vector<1x64xf32>
    %219 = vector.extract_strided_slice %105 {offsets = [29, 0], sizes = [1, 64], strides = [1, 1]} : vector<64x64xf32> to vector<1x64xf32>
    %220 = arith.maximumf %218, %219 : vector<1x64xf32>
    %221 = arith.maximumf %217, %220 : vector<1x64xf32>
    %cst_97 = arith.constant 0.000000e+00 : f32
    %222 = vector.broadcast %cst_97 : f32 to vector<1x64xf32>
    %223 = arith.cmpf ogt, %221, %222 : vector<1x64xf32>
    %224 = math.exp %221 : vector<1x64xf32>
    %cst_98 = arith.constant 1.000000e+00 : f32
    %225 = vector.broadcast %cst_98 : f32 to vector<1x64xf32>
    %226 = arith.subf %224, %225 : vector<1x64xf32>
    %227 = arith.select %223, %221, %226 : vector<1x64xi1>, vector<1x64xf32>
    %228 = arith.truncf %227 : vector<1x64xf32> to vector<1x64xbf16>
    %c6_99 = arith.constant 6 : index
    %c0_100 = arith.constant 0 : index
    %c0_101 = arith.constant 0 : index
    %229 = vector.load %arg6[%c6_99, %c0_100, %c0_101] : memref<16x64x128xbf16, #tpu.memory_space<vmem>>, vector<1x64x128xbf16>
    %230 = vector.shape_cast %229 : vector<1x64x128xbf16> to vector<64x128xbf16>
    %cst_102 = arith.constant dense<0.000000e+00> : vector<1x128xf32>
    %231 = tpu.matmul %228, %230, %cst_102 {dimension_numbers = #tpu.dot_dimension_numbers<[1], [0], [0], [1], [0, 0, 1, 1], [], []>} : vector<1x64xbf16>, vector<64x128xbf16>, vector<1x128xf32> -> vector<1x128xf32>
    %232 = arith.addf %214, %231 : vector<1x128xf32>
    %233 = vector.extract_strided_slice %105 {offsets = [22, 0], sizes = [1, 64], strides = [1, 1]} : vector<64x64xf32> to vector<1x64xf32>
    %234 = vector.extract_strided_slice %105 {offsets = [23, 0], sizes = [1, 64], strides = [1, 1]} : vector<64x64xf32> to vector<1x64xf32>
    %235 = arith.maximumf %233, %234 : vector<1x64xf32>
    %236 = vector.extract_strided_slice %105 {offsets = [30, 0], sizes = [1, 64], strides = [1, 1]} : vector<64x64xf32> to vector<1x64xf32>
    %237 = vector.extract_strided_slice %105 {offsets = [31, 0], sizes = [1, 64], strides = [1, 1]} : vector<64x64xf32> to vector<1x64xf32>
    %238 = arith.maximumf %236, %237 : vector<1x64xf32>
    %239 = arith.maximumf %235, %238 : vector<1x64xf32>
    %cst_103 = arith.constant 0.000000e+00 : f32
    %240 = vector.broadcast %cst_103 : f32 to vector<1x64xf32>
    %241 = arith.cmpf ogt, %239, %240 : vector<1x64xf32>
    %242 = math.exp %239 : vector<1x64xf32>
    %cst_104 = arith.constant 1.000000e+00 : f32
    %243 = vector.broadcast %cst_104 : f32 to vector<1x64xf32>
    %244 = arith.subf %242, %243 : vector<1x64xf32>
    %245 = arith.select %241, %239, %244 : vector<1x64xi1>, vector<1x64xf32>
    %246 = arith.truncf %245 : vector<1x64xf32> to vector<1x64xbf16>
    %c7_105 = arith.constant 7 : index
    %c0_106 = arith.constant 0 : index
    %c0_107 = arith.constant 0 : index
    %247 = vector.load %arg6[%c7_105, %c0_106, %c0_107] : memref<16x64x128xbf16, #tpu.memory_space<vmem>>, vector<1x64x128xbf16>
    %248 = vector.shape_cast %247 : vector<1x64x128xbf16> to vector<64x128xbf16>
    %cst_108 = arith.constant dense<0.000000e+00> : vector<1x128xf32>
    %249 = tpu.matmul %246, %248, %cst_108 {dimension_numbers = #tpu.dot_dimension_numbers<[1], [0], [0], [1], [0, 0, 1, 1], [], []>} : vector<1x64xbf16>, vector<64x128xbf16>, vector<1x128xf32> -> vector<1x128xf32>
    %250 = arith.addf %232, %249 : vector<1x128xf32>
    %251 = vector.extract_strided_slice %105 {offsets = [32, 0], sizes = [1, 64], strides = [1, 1]} : vector<64x64xf32> to vector<1x64xf32>
    %252 = vector.extract_strided_slice %105 {offsets = [33, 0], sizes = [1, 64], strides = [1, 1]} : vector<64x64xf32> to vector<1x64xf32>
    %253 = arith.maximumf %251, %252 : vector<1x64xf32>
    %254 = vector.extract_strided_slice %105 {offsets = [40, 0], sizes = [1, 64], strides = [1, 1]} : vector<64x64xf32> to vector<1x64xf32>
    %255 = vector.extract_strided_slice %105 {offsets = [41, 0], sizes = [1, 64], strides = [1, 1]} : vector<64x64xf32> to vector<1x64xf32>
    %256 = arith.maximumf %254, %255 : vector<1x64xf32>
    %257 = arith.maximumf %253, %256 : vector<1x64xf32>
    %cst_109 = arith.constant 0.000000e+00 : f32
    %258 = vector.broadcast %cst_109 : f32 to vector<1x64xf32>
    %259 = arith.cmpf ogt, %257, %258 : vector<1x64xf32>
    %260 = math.exp %257 : vector<1x64xf32>
    %cst_110 = arith.constant 1.000000e+00 : f32
    %261 = vector.broadcast %cst_110 : f32 to vector<1x64xf32>
    %262 = arith.subf %260, %261 : vector<1x64xf32>
    %263 = arith.select %259, %257, %262 : vector<1x64xi1>, vector<1x64xf32>
    %264 = arith.truncf %263 : vector<1x64xf32> to vector<1x64xbf16>
    %c8_111 = arith.constant 8 : index
    %c0_112 = arith.constant 0 : index
    %c0_113 = arith.constant 0 : index
    %265 = vector.load %arg6[%c8_111, %c0_112, %c0_113] : memref<16x64x128xbf16, #tpu.memory_space<vmem>>, vector<1x64x128xbf16>
    %266 = vector.shape_cast %265 : vector<1x64x128xbf16> to vector<64x128xbf16>
    %cst_114 = arith.constant dense<0.000000e+00> : vector<1x128xf32>
    %267 = tpu.matmul %264, %266, %cst_114 {dimension_numbers = #tpu.dot_dimension_numbers<[1], [0], [0], [1], [0, 0, 1, 1], [], []>} : vector<1x64xbf16>, vector<64x128xbf16>, vector<1x128xf32> -> vector<1x128xf32>
    %268 = arith.addf %250, %267 : vector<1x128xf32>
    %269 = vector.extract_strided_slice %105 {offsets = [34, 0], sizes = [1, 64], strides = [1, 1]} : vector<64x64xf32> to vector<1x64xf32>
    %270 = vector.extract_strided_slice %105 {offsets = [35, 0], sizes = [1, 64], strides = [1, 1]} : vector<64x64xf32> to vector<1x64xf32>
    %271 = arith.maximumf %269, %270 : vector<1x64xf32>
    %272 = vector.extract_strided_slice %105 {offsets = [42, 0], sizes = [1, 64], strides = [1, 1]} : vector<64x64xf32> to vector<1x64xf32>
    %273 = vector.extract_strided_slice %105 {offsets = [43, 0], sizes = [1, 64], strides = [1, 1]} : vector<64x64xf32> to vector<1x64xf32>
    %274 = arith.maximumf %272, %273 : vector<1x64xf32>
    %275 = arith.maximumf %271, %274 : vector<1x64xf32>
    %cst_115 = arith.constant 0.000000e+00 : f32
    %276 = vector.broadcast %cst_115 : f32 to vector<1x64xf32>
    %277 = arith.cmpf ogt, %275, %276 : vector<1x64xf32>
    %278 = math.exp %275 : vector<1x64xf32>
    %cst_116 = arith.constant 1.000000e+00 : f32
    %279 = vector.broadcast %cst_116 : f32 to vector<1x64xf32>
    %280 = arith.subf %278, %279 : vector<1x64xf32>
    %281 = arith.select %277, %275, %280 : vector<1x64xi1>, vector<1x64xf32>
    %282 = arith.truncf %281 : vector<1x64xf32> to vector<1x64xbf16>
    %c9_117 = arith.constant 9 : index
    %c0_118 = arith.constant 0 : index
    %c0_119 = arith.constant 0 : index
    %283 = vector.load %arg6[%c9_117, %c0_118, %c0_119] : memref<16x64x128xbf16, #tpu.memory_space<vmem>>, vector<1x64x128xbf16>
    %284 = vector.shape_cast %283 : vector<1x64x128xbf16> to vector<64x128xbf16>
    %cst_120 = arith.constant dense<0.000000e+00> : vector<1x128xf32>
    %285 = tpu.matmul %282, %284, %cst_120 {dimension_numbers = #tpu.dot_dimension_numbers<[1], [0], [0], [1], [0, 0, 1, 1], [], []>} : vector<1x64xbf16>, vector<64x128xbf16>, vector<1x128xf32> -> vector<1x128xf32>
    %286 = arith.addf %268, %285 : vector<1x128xf32>
    %287 = vector.extract_strided_slice %105 {offsets = [36, 0], sizes = [1, 64], strides = [1, 1]} : vector<64x64xf32> to vector<1x64xf32>
    %288 = vector.extract_strided_slice %105 {offsets = [37, 0], sizes = [1, 64], strides = [1, 1]} : vector<64x64xf32> to vector<1x64xf32>
    %289 = arith.maximumf %287, %288 : vector<1x64xf32>
    %290 = vector.extract_strided_slice %105 {offsets = [44, 0], sizes = [1, 64], strides = [1, 1]} : vector<64x64xf32> to vector<1x64xf32>
    %291 = vector.extract_strided_slice %105 {offsets = [45, 0], sizes = [1, 64], strides = [1, 1]} : vector<64x64xf32> to vector<1x64xf32>
    %292 = arith.maximumf %290, %291 : vector<1x64xf32>
    %293 = arith.maximumf %289, %292 : vector<1x64xf32>
    %cst_121 = arith.constant 0.000000e+00 : f32
    %294 = vector.broadcast %cst_121 : f32 to vector<1x64xf32>
    %295 = arith.cmpf ogt, %293, %294 : vector<1x64xf32>
    %296 = math.exp %293 : vector<1x64xf32>
    %cst_122 = arith.constant 1.000000e+00 : f32
    %297 = vector.broadcast %cst_122 : f32 to vector<1x64xf32>
    %298 = arith.subf %296, %297 : vector<1x64xf32>
    %299 = arith.select %295, %293, %298 : vector<1x64xi1>, vector<1x64xf32>
    %300 = arith.truncf %299 : vector<1x64xf32> to vector<1x64xbf16>
    %c10 = arith.constant 10 : index
    %c0_123 = arith.constant 0 : index
    %c0_124 = arith.constant 0 : index
    %301 = vector.load %arg6[%c10, %c0_123, %c0_124] : memref<16x64x128xbf16, #tpu.memory_space<vmem>>, vector<1x64x128xbf16>
    %302 = vector.shape_cast %301 : vector<1x64x128xbf16> to vector<64x128xbf16>
    %cst_125 = arith.constant dense<0.000000e+00> : vector<1x128xf32>
    %303 = tpu.matmul %300, %302, %cst_125 {dimension_numbers = #tpu.dot_dimension_numbers<[1], [0], [0], [1], [0, 0, 1, 1], [], []>} : vector<1x64xbf16>, vector<64x128xbf16>, vector<1x128xf32> -> vector<1x128xf32>
    %304 = arith.addf %286, %303 : vector<1x128xf32>
    %305 = vector.extract_strided_slice %105 {offsets = [38, 0], sizes = [1, 64], strides = [1, 1]} : vector<64x64xf32> to vector<1x64xf32>
    %306 = vector.extract_strided_slice %105 {offsets = [39, 0], sizes = [1, 64], strides = [1, 1]} : vector<64x64xf32> to vector<1x64xf32>
    %307 = arith.maximumf %305, %306 : vector<1x64xf32>
    %308 = vector.extract_strided_slice %105 {offsets = [46, 0], sizes = [1, 64], strides = [1, 1]} : vector<64x64xf32> to vector<1x64xf32>
    %309 = vector.extract_strided_slice %105 {offsets = [47, 0], sizes = [1, 64], strides = [1, 1]} : vector<64x64xf32> to vector<1x64xf32>
    %310 = arith.maximumf %308, %309 : vector<1x64xf32>
    %311 = arith.maximumf %307, %310 : vector<1x64xf32>
    %cst_126 = arith.constant 0.000000e+00 : f32
    %312 = vector.broadcast %cst_126 : f32 to vector<1x64xf32>
    %313 = arith.cmpf ogt, %311, %312 : vector<1x64xf32>
    %314 = math.exp %311 : vector<1x64xf32>
    %cst_127 = arith.constant 1.000000e+00 : f32
    %315 = vector.broadcast %cst_127 : f32 to vector<1x64xf32>
    %316 = arith.subf %314, %315 : vector<1x64xf32>
    %317 = arith.select %313, %311, %316 : vector<1x64xi1>, vector<1x64xf32>
    %318 = arith.truncf %317 : vector<1x64xf32> to vector<1x64xbf16>
    %c11 = arith.constant 11 : index
    %c0_128 = arith.constant 0 : index
    %c0_129 = arith.constant 0 : index
    %319 = vector.load %arg6[%c11, %c0_128, %c0_129] : memref<16x64x128xbf16, #tpu.memory_space<vmem>>, vector<1x64x128xbf16>
    %320 = vector.shape_cast %319 : vector<1x64x128xbf16> to vector<64x128xbf16>
    %cst_130 = arith.constant dense<0.000000e+00> : vector<1x128xf32>
    %321 = tpu.matmul %318, %320, %cst_130 {dimension_numbers = #tpu.dot_dimension_numbers<[1], [0], [0], [1], [0, 0, 1, 1], [], []>} : vector<1x64xbf16>, vector<64x128xbf16>, vector<1x128xf32> -> vector<1x128xf32>
    %322 = arith.addf %304, %321 : vector<1x128xf32>
    %323 = vector.extract_strided_slice %105 {offsets = [48, 0], sizes = [1, 64], strides = [1, 1]} : vector<64x64xf32> to vector<1x64xf32>
    %324 = vector.extract_strided_slice %105 {offsets = [49, 0], sizes = [1, 64], strides = [1, 1]} : vector<64x64xf32> to vector<1x64xf32>
    %325 = arith.maximumf %323, %324 : vector<1x64xf32>
    %326 = vector.extract_strided_slice %105 {offsets = [56, 0], sizes = [1, 64], strides = [1, 1]} : vector<64x64xf32> to vector<1x64xf32>
    %327 = vector.extract_strided_slice %105 {offsets = [57, 0], sizes = [1, 64], strides = [1, 1]} : vector<64x64xf32> to vector<1x64xf32>
    %328 = arith.maximumf %326, %327 : vector<1x64xf32>
    %329 = arith.maximumf %325, %328 : vector<1x64xf32>
    %cst_131 = arith.constant 0.000000e+00 : f32
    %330 = vector.broadcast %cst_131 : f32 to vector<1x64xf32>
    %331 = arith.cmpf ogt, %329, %330 : vector<1x64xf32>
    %332 = math.exp %329 : vector<1x64xf32>
    %cst_132 = arith.constant 1.000000e+00 : f32
    %333 = vector.broadcast %cst_132 : f32 to vector<1x64xf32>
    %334 = arith.subf %332, %333 : vector<1x64xf32>
    %335 = arith.select %331, %329, %334 : vector<1x64xi1>, vector<1x64xf32>
    %336 = arith.truncf %335 : vector<1x64xf32> to vector<1x64xbf16>
    %c12 = arith.constant 12 : index
    %c0_133 = arith.constant 0 : index
    %c0_134 = arith.constant 0 : index
    %337 = vector.load %arg6[%c12, %c0_133, %c0_134] : memref<16x64x128xbf16, #tpu.memory_space<vmem>>, vector<1x64x128xbf16>
    %338 = vector.shape_cast %337 : vector<1x64x128xbf16> to vector<64x128xbf16>
    %cst_135 = arith.constant dense<0.000000e+00> : vector<1x128xf32>
    %339 = tpu.matmul %336, %338, %cst_135 {dimension_numbers = #tpu.dot_dimension_numbers<[1], [0], [0], [1], [0, 0, 1, 1], [], []>} : vector<1x64xbf16>, vector<64x128xbf16>, vector<1x128xf32> -> vector<1x128xf32>
    %340 = arith.addf %322, %339 : vector<1x128xf32>
    %341 = vector.extract_strided_slice %105 {offsets = [50, 0], sizes = [1, 64], strides = [1, 1]} : vector<64x64xf32> to vector<1x64xf32>
    %342 = vector.extract_strided_slice %105 {offsets = [51, 0], sizes = [1, 64], strides = [1, 1]} : vector<64x64xf32> to vector<1x64xf32>
    %343 = arith.maximumf %341, %342 : vector<1x64xf32>
    %344 = vector.extract_strided_slice %105 {offsets = [58, 0], sizes = [1, 64], strides = [1, 1]} : vector<64x64xf32> to vector<1x64xf32>
    %345 = vector.extract_strided_slice %105 {offsets = [59, 0], sizes = [1, 64], strides = [1, 1]} : vector<64x64xf32> to vector<1x64xf32>
    %346 = arith.maximumf %344, %345 : vector<1x64xf32>
    %347 = arith.maximumf %343, %346 : vector<1x64xf32>
    %cst_136 = arith.constant 0.000000e+00 : f32
    %348 = vector.broadcast %cst_136 : f32 to vector<1x64xf32>
    %349 = arith.cmpf ogt, %347, %348 : vector<1x64xf32>
    %350 = math.exp %347 : vector<1x64xf32>
    %cst_137 = arith.constant 1.000000e+00 : f32
    %351 = vector.broadcast %cst_137 : f32 to vector<1x64xf32>
    %352 = arith.subf %350, %351 : vector<1x64xf32>
    %353 = arith.select %349, %347, %352 : vector<1x64xi1>, vector<1x64xf32>
    %354 = arith.truncf %353 : vector<1x64xf32> to vector<1x64xbf16>
    %c13 = arith.constant 13 : index
    %c0_138 = arith.constant 0 : index
    %c0_139 = arith.constant 0 : index
    %355 = vector.load %arg6[%c13, %c0_138, %c0_139] : memref<16x64x128xbf16, #tpu.memory_space<vmem>>, vector<1x64x128xbf16>
    %356 = vector.shape_cast %355 : vector<1x64x128xbf16> to vector<64x128xbf16>
    %cst_140 = arith.constant dense<0.000000e+00> : vector<1x128xf32>
    %357 = tpu.matmul %354, %356, %cst_140 {dimension_numbers = #tpu.dot_dimension_numbers<[1], [0], [0], [1], [0, 0, 1, 1], [], []>} : vector<1x64xbf16>, vector<64x128xbf16>, vector<1x128xf32> -> vector<1x128xf32>
    %358 = arith.addf %340, %357 : vector<1x128xf32>
    %359 = vector.extract_strided_slice %105 {offsets = [52, 0], sizes = [1, 64], strides = [1, 1]} : vector<64x64xf32> to vector<1x64xf32>
    %360 = vector.extract_strided_slice %105 {offsets = [53, 0], sizes = [1, 64], strides = [1, 1]} : vector<64x64xf32> to vector<1x64xf32>
    %361 = arith.maximumf %359, %360 : vector<1x64xf32>
    %362 = vector.extract_strided_slice %105 {offsets = [60, 0], sizes = [1, 64], strides = [1, 1]} : vector<64x64xf32> to vector<1x64xf32>
    %363 = vector.extract_strided_slice %105 {offsets = [61, 0], sizes = [1, 64], strides = [1, 1]} : vector<64x64xf32> to vector<1x64xf32>
    %364 = arith.maximumf %362, %363 : vector<1x64xf32>
    %365 = arith.maximumf %361, %364 : vector<1x64xf32>
    %cst_141 = arith.constant 0.000000e+00 : f32
    %366 = vector.broadcast %cst_141 : f32 to vector<1x64xf32>
    %367 = arith.cmpf ogt, %365, %366 : vector<1x64xf32>
    %368 = math.exp %365 : vector<1x64xf32>
    %cst_142 = arith.constant 1.000000e+00 : f32
    %369 = vector.broadcast %cst_142 : f32 to vector<1x64xf32>
    %370 = arith.subf %368, %369 : vector<1x64xf32>
    %371 = arith.select %367, %365, %370 : vector<1x64xi1>, vector<1x64xf32>
    %372 = arith.truncf %371 : vector<1x64xf32> to vector<1x64xbf16>
    %c14 = arith.constant 14 : index
    %c0_143 = arith.constant 0 : index
    %c0_144 = arith.constant 0 : index
    %373 = vector.load %arg6[%c14, %c0_143, %c0_144] : memref<16x64x128xbf16, #tpu.memory_space<vmem>>, vector<1x64x128xbf16>
    %374 = vector.shape_cast %373 : vector<1x64x128xbf16> to vector<64x128xbf16>
    %cst_145 = arith.constant dense<0.000000e+00> : vector<1x128xf32>
    %375 = tpu.matmul %372, %374, %cst_145 {dimension_numbers = #tpu.dot_dimension_numbers<[1], [0], [0], [1], [0, 0, 1, 1], [], []>} : vector<1x64xbf16>, vector<64x128xbf16>, vector<1x128xf32> -> vector<1x128xf32>
    %376 = arith.addf %358, %375 : vector<1x128xf32>
    %377 = vector.extract_strided_slice %105 {offsets = [54, 0], sizes = [1, 64], strides = [1, 1]} : vector<64x64xf32> to vector<1x64xf32>
    %378 = vector.extract_strided_slice %105 {offsets = [55, 0], sizes = [1, 64], strides = [1, 1]} : vector<64x64xf32> to vector<1x64xf32>
    %379 = arith.maximumf %377, %378 : vector<1x64xf32>
    %380 = vector.extract_strided_slice %105 {offsets = [62, 0], sizes = [1, 64], strides = [1, 1]} : vector<64x64xf32> to vector<1x64xf32>
    %381 = vector.extract_strided_slice %105 {offsets = [63, 0], sizes = [1, 64], strides = [1, 1]} : vector<64x64xf32> to vector<1x64xf32>
    %382 = arith.maximumf %380, %381 : vector<1x64xf32>
    %383 = arith.maximumf %379, %382 : vector<1x64xf32>
    %cst_146 = arith.constant 0.000000e+00 : f32
    %384 = vector.broadcast %cst_146 : f32 to vector<1x64xf32>
    %385 = arith.cmpf ogt, %383, %384 : vector<1x64xf32>
    %386 = math.exp %383 : vector<1x64xf32>
    %cst_147 = arith.constant 1.000000e+00 : f32
    %387 = vector.broadcast %cst_147 : f32 to vector<1x64xf32>
    %388 = arith.subf %386, %387 : vector<1x64xf32>
    %389 = arith.select %385, %383, %388 : vector<1x64xi1>, vector<1x64xf32>
    %390 = arith.truncf %389 : vector<1x64xf32> to vector<1x64xbf16>
    %c15_148 = arith.constant 15 : index
    %c0_149 = arith.constant 0 : index
    %c0_150 = arith.constant 0 : index
    %391 = vector.load %arg6[%c15_148, %c0_149, %c0_150] : memref<16x64x128xbf16, #tpu.memory_space<vmem>>, vector<1x64x128xbf16>
    %392 = vector.shape_cast %391 : vector<1x64x128xbf16> to vector<64x128xbf16>
    %cst_151 = arith.constant dense<0.000000e+00> : vector<1x128xf32>
    %393 = tpu.matmul %390, %392, %cst_151 {dimension_numbers = #tpu.dot_dimension_numbers<[1], [0], [0], [1], [0, 0, 1, 1], [], []>} : vector<1x64xbf16>, vector<64x128xbf16>, vector<1x128xf32> -> vector<1x128xf32>
    %394 = arith.addf %376, %393 : vector<1x128xf32>
    %c0_152 = arith.constant 0 : index
    %c0_153 = arith.constant 0 : index
    %395 = vector.load %arg7[%c0_152, %c0_153] : memref<1x128xf32, #tpu.memory_space<vmem>>, vector<1x128xf32>
    %396 = arith.addf %394, %395 : vector<1x128xf32>
    %cst_154 = arith.constant 0.000000e+00 : f32
    %397 = vector.broadcast %cst_154 : f32 to vector<1x128xf32>
    %398 = arith.cmpf ogt, %396, %397 : vector<1x128xf32>
    %399 = math.exp %396 : vector<1x128xf32>
    %cst_155 = arith.constant 1.000000e+00 : f32
    %400 = vector.broadcast %cst_155 : f32 to vector<1x128xf32>
    %401 = arith.subf %399, %400 : vector<1x128xf32>
    %402 = arith.select %398, %396, %401 : vector<1x128xi1>, vector<1x128xf32>
    %403 = arith.truncf %402 : vector<1x128xf32> to vector<1x128xbf16>
    %c0_156 = arith.constant 0 : index
    %c0_157 = arith.constant 0 : index
    %404 = vector.load %arg8[%c0_156, %c0_157] : memref<128x10xbf16, #tpu.memory_space<vmem>>, vector<128x10xbf16>
    %cst_158 = arith.constant dense<0.000000e+00> : vector<1x10xf32>
    %405 = tpu.matmul %403, %404, %cst_158 {dimension_numbers = #tpu.dot_dimension_numbers<[1], [0], [0], [1], [0, 0, 1, 1], [], []>} : vector<1x128xbf16>, vector<128x10xbf16>, vector<1x10xf32> -> vector<1x10xf32>
    %c0_159 = arith.constant 0 : index
    %c0_160 = arith.constant 0 : index
    %406 = vector.load %arg9[%c0_159, %c0_160] : memref<1x10xf32, #tpu.memory_space<vmem>>, vector<1x10xf32>
    %407 = arith.addf %405, %406 : vector<1x10xf32>
    %cst_161 = arith.constant dense<0xFF800000> : vector<1xf32>
    %408 = vector.multi_reduction <maximumf>, %407, %cst_161 [1] : vector<1x10xf32> to vector<1xf32>
    %409 = vector.shape_cast %408 : vector<1xf32> to vector<1x1xf32>
    %410 = vector.broadcast %409 : vector<1x1xf32> to vector<1x10xf32>
    %411 = arith.subf %407, %410 : vector<1x10xf32>
    %412 = math.exp %411 : vector<1x10xf32>
    %cst_162 = arith.constant dense<0.000000e+00> : vector<1xf32>
    %413 = vector.multi_reduction <add>, %412, %cst_162 [1] : vector<1x10xf32> to vector<1xf32>
    %414 = vector.shape_cast %413 : vector<1xf32> to vector<1x1xf32>
    %415 = tpu.reciprocal %414 {approx = true} : vector<1x1xf32> -> vector<1x1xf32>
    %416 = vector.broadcast %415 : vector<1x1xf32> to vector<1x10xf32>
    %417 = arith.mulf %412, %416 : vector<1x10xf32>
    %c0_163 = arith.constant 0 : index
    %c0_164 = arith.constant 0 : index
    %c0_165 = arith.constant 0 : index
    %418 = vector.load %arg10[%c0_163, %c0_164, %c0_165] : memref<1x1x10xf32, #tpu.memory_space<vmem>>, vector<1x1x10xf32>
    %419 = vector.shape_cast %418 : vector<1x1x10xf32> to vector<1x10xf32>
    %420 = vector.shape_cast %417 : vector<1x10xf32> to vector<1x1x10xf32>
    tpu.vector_store %arg10[%c0_163, %c0_164, %c0_165], %420 {strides = array<i32>} : memref<1x1x10xf32, #tpu.memory_space<vmem>>, vector<1x1x10xf32>,
    return
  }
  func.func @transform_0(%arg0: i32) -> (i32, i32, i32) {
    %c0_i32 = arith.constant 0 : i32
    %c0_i32_0 = arith.constant 0 : i32
    %c0_i32_1 = arith.constant 0 : i32
    return %arg0, %c0_i32, %c0_i32_0 : i32, i32, i32
  }
  func.func @transform_1(%arg0: i32) -> (i32, i32) {
    %c0_i32 = arith.constant 0 : i32
    %c0_i32_0 = arith.constant 0 : i32
    %c0_i32_1 = arith.constant 0 : i32
    return %c0_i32, %c0_i32_0 : i32, i32
  }
  func.func @transform_2(%arg0: i32) -> (i32, i32) {
    %c0_i32 = arith.constant 0 : i32
    %c0_i32_0 = arith.constant 0 : i32
    %c0_i32_1 = arith.constant 0 : i32
    return %c0_i32, %c0_i32_0 : i32, i32
  }
  func.func @transform_3(%arg0: i32) -> (i32, i32, i32) {
    %c0_i32 = arith.constant 0 : i32
    %c0_i32_0 = arith.constant 0 : i32
    %c0_i32_1 = arith.constant 0 : i32
    %c0_i32_2 = arith.constant 0 : i32
    return %c0_i32, %c0_i32_0, %c0_i32_1 : i32, i32, i32
  }
  func.func @transform_4(%arg0: i32) -> (i32, i32) {
    %c0_i32 = arith.constant 0 : i32
    %c0_i32_0 = arith.constant 0 : i32
    %c0_i32_1 = arith.constant 0 : i32
    return %c0_i32, %c0_i32_0 : i32, i32
  }
  func.func @transform_5(%arg0: i32) -> (i32, i32, i32) {
    %c0_i32 = arith.constant 0 : i32
    %c0_i32_0 = arith.constant 0 : i32
    %c0_i32_1 = arith.constant 0 : i32
    %c0_i32_2 = arith.constant 0 : i32
    return %c0_i32, %c0_i32_0, %c0_i32_1 : i32, i32, i32
  }
  func.func @transform_6(%arg0: i32) -> (i32, i32) {
    %c0_i32 = arith.constant 0 : i32
    %c0_i32_0 = arith.constant 0 : i32
    %c0_i32_1 = arith.constant 0 : i32
    return %c0_i32, %c0_i32_0 : i32, i32
  }
  func.func @transform_7(%arg0: i32) -> (i32, i32) {
    %c0_i32 = arith.constant 0 : i32
    %c0_i32_0 = arith.constant 0 : i32
    %c0_i32_1 = arith.constant 0 : i32
    return %c0_i32, %c0_i32_0 : i32, i32
  }
  func.func @transform_8(%arg0: i32) -> (i32, i32) {
    %c0_i32 = arith.constant 0 : i32
    %c0_i32_0 = arith.constant 0 : i32
    %c0_i32_1 = arith.constant 0 : i32
    return %c0_i32, %c0_i32_0 : i32, i32
  }
  func.func @transform_9(%arg0: i32) -> (i32, i32, i32) {
    %c0_i32 = arith.constant 0 : i32
    %c0_i32_0 = arith.constant 0 : i32
    %c0_i32_1 = arith.constant 0 : i32
    return %arg0, %c0_i32, %c0_i32_0 : i32, i32, i32
  }
}

</mosaic_0001>

<bundles_post_ra>
// kernel: cnn_forward.1
= control target key start
LH: loop header
LB: loop body
LE: loop exit
PB: predicated region body
PF: predicated region fallthrough
CT: control target
= control target key end

     0   :  { %14 = vsyncpa [#allocation4], 0  ;;  %s4396_s0 = inlined_call_operand.vmem [shape: bf16[2,256,9], index: 0, kind: input, shape index: {}]   ;;  %s4397_s1 = inlined_call_operand.vmem [shape: bf16[9,32], index: 1, kind: input, shape index: {}]   ;;  %s4398_s2 = inlined_call_operand.vmem [shape: f32[1,32], index: 2, kind: input, shape index: {}]   ;;  %s4399_s3 = inlined_call_operand.vmem [shape: bf16[9,32,64], index: 3, kind: input, shape index: {}]   ;;  %s4400_s4 = inlined_call_operand.vmem [shape: f32[1,64], index: 4, kind: input, shape index: {}]   ;;  %s4401_s5 = inlined_call_operand.vmem [shape: bf16[16,64,128], index: 5, kind: input, shape index: {}]   ;;  %s4402_s6 = inlined_call_operand.vmem [shape: f32[1,128], index: 6, kind: input, shape index: {}]   ;;  %s4403_s7 = inlined_call_operand.vmem [shape: bf16[128,10], index: 7, kind: input, shape index: {}]   ;;  %s4404_s8 = inlined_call_operand.vmem [shape: f32[1,10], index: 8, kind: input, shape index: {}]   ;;  %s4405_s9 = inlined_call_operand.hbm [shape: f32[2,1,10], index: 9, kind: output, shape index: {}]  }
   0x1   :  { %16 = vsyncpa [#allocation4 + $0x1], 0  ;;  %s3438_s30 = smov 0   ;;  %s3440_s10 = smov 0  }
   0x2   :  { %s3442_s11 = smov 0   ;;  %s3444_s12 = smov 0  }
   0x3 LB: > { %s3459_s13 = sadd.s32 4294967295, %s3384_s12   ;;  %s2495_s14 = sadd.s32 4294967294, %s3384_s12   ;;  %s3384_s12 = sphi %s3444_s12, %s4443_s12   ;;  %s3380_s11 = sphi %s3442_s11, %s4442_s11   ;;  %s3376_s10 = sphi %s3440_s10, %s4441_s10   ;;  %s3372_s30 = sphi %s3438_s30, %s4440_s30  }
   0x4   : > { %s3463_s15 = sadd.s32 1, %s3384_s12   ;;  %s223_s16 = sadd.s32 1, %s3380_s11 }
   0x5   : > { %s220_s17 = ssub.s32 %s3384_s12, %s3463_s15  ;;  %p233_p0 = scmp.ne.s32.totalorder %s3380_s11, %s3376_s10 }
   0x6   : > { %p221_p1 = scmp.eq.s32.totalorder %s220_s17, 0  ;;  %p234_p2 = scmp.eq.s32.totalorder %s3459_s13, 1 }
   0x7   : > { %p239_p3 = scmp.ne.s32.totalorder %s3376_s10, %s3372_s30  ;;  %p240_p4 = scmp.eq.s32.totalorder %s2495_s14, 1 }
   0x8   : > { %s3474_s18 = scalar_select %p221_p1, %s3380_s11, %s223_s16  }
   0x9   : > { %p3476_p5 = por %p234_p2, %p233_p0  ;;  %p3480_p6 = por %p240_p4, %p239_p3 }
   0xa   : > { %p2498_p7 = scmp.ge.s32.totalorder %s3384_s12, 1  ;;  %p290_p8 = scmp.lt.s32.totalorder %s3384_s12, 3 }
   0xc   : > { %p291_p9 = pnand %p2498_p7, %p290_p8 }
   0xd   : > { %p325_p10 = scmp.lt.s32.totalorder (!%p291_p9), %s3459_s13, 1 }
   0xe   : > { %294 = sbr.rel (%p291_p9) target bundleno = 1265 (0x4f1), region = 56 }
  0x13   : > { %v2567_v0 = vld [vmem:[%s4397_s1] sm:$0xf]  ;;  %v3173_v1 = vld [vmem:[%s4397_s1] sm:$0x10]  ;;  %vm503_vm0 = vcmask 1043456   ;;  %vm504_vm1 = vcmask 1044480  }
  0x14   : > { %v2568_v2 = vor.u32 %v3173_v1, %v2567_v0  ;;  %v3386_v3 = vmov 65535   ;;  %s326_s25 = scalar_select %p325_p10, %s3459_s13, 1  ;;  %vm454_vm2 = vcmask 72704   ;;  %v3532_v28 = vld [vmem:[%s4398_s2] ss:$0 sm:$0xff]  ;;  %vm623_vm3 = vcmask 261120  }
  0x15   : > { %v505_v4 = vsel %vm503_vm0, 4294967295, %v3386_v3  ;;  %v3387_v61 = vmov 0.0   ;;  %v3177_v1 = vld [vmem:[%s4399_s3 + $0x18] sm:$0xff] }
  0x16   : > { %v506_v5 = vsel %vm504_vm1, %v505_v4, 0  ;;  %s3156_s26 = sshll.u32 %s326_s25, 7  ;;  %632 = vst.msk [vmem:[#allocation2 + $0x40] sm:$0xff] %vm623_vm3, %v3387_v61  ;;  %v3176_v4 = vld [vmem:[%s4399_s3 + $0x10] sm:$0xff] }
  0x17   : > { %v508_v6 = vand.u32 %v2568_v2, %v506_v5  ;;  %s3497_s29 = scalar_lea.vmem %s4396_s0, %s3156_s26  ;;  %624 = vst.msk [vmem:[#allocation2] sm:$0xff] %vm623_vm3, %v3387_v61  ;;  %v3175_v2 = vld [vmem:[%s4399_s3 + $0x8] sm:$0xff]  ;;  %v3174_v5 = vld [vmem:[%s4399_s3] sm:$0xff]  ;;  %s323_s26 = sand.u32 1, %s3376_s10  }
  0x18   : > { %v3157_v7 = vld [vmem:[%s3497_s29] sm:$0xff]  ;;  %v3158_v8 = vld [vmem:[%s3497_s29 + $0x8] sm:$0xff]  ;;  %v3159_v9 = vld [vmem:[%s3497_s29 + $0x10] sm:$0xff]  ;;  %625 = vst.msk [vmem:[#allocation2 + $0x8] sm:$0xff] %vm623_vm3, %v3387_v61  ;;  %817 = vmatpush.bf16.msra.mxu2 %v3175_v2  ;;  %s324_s14 = scalar_lea.vmem [#allocation3], %s323_s26  ;;  %s2428_s21 = scalar_lea.sflag [#allocation4], %s323_s26 }
  0x19   : > { %517 = vmatpush.bf16.msra.mxu0 %v508_v6  ;;  %3264 = vmatpush.bf16.msra.mxu1 %v508_v6  ;;  %v3160_v10 = vld [vmem:[%s3497_s29 + $0x18] sm:$0xff]  ;;  %v3161_v11 = vld [vmem:[%s3497_s29 + $0x20] sm:$0xff]  ;;  %v3162_v12 = vld [vmem:[%s3497_s29 + $0x28] sm:$0xff]  ;;  %626 = vst.msk [vmem:[#allocation2 + $0x10] sm:$0xff] %vm623_vm3, %v3387_v61  ;;  %s2438_s16 = sshll.u32 %s324_s14, 4  ;;  %s2439_s16 = int_to_ptr.vmem [resolvable:$true] %s2438_s16 }
  0x1a   : > { %v3163_v13 = vld [vmem:[%s3497_s29 + $0x30] sm:$0xff]  ;;  %v3164_v14 = vld [vmem:[%s3497_s29 + $0x38] sm:$0xff]  ;;  %v3165_v15 = vld [vmem:[%s3497_s29 + $0x40] sm:$0xff]  ;;  %627 = vst.msk [vmem:[#allocation2 + $0x18] sm:$0xff] %vm623_vm3, %v3387_v61 }
  0x1b   : > { %v3166_v18 = vld [vmem:[%s3497_s29 + $0x48] sm:$0xff]  ;;  %v3172_v20 = vld [vmem:[%s3497_s29 + $0x78] sm:$0xff]  ;;  %v3167_v22 = vld [vmem:[%s3497_s29 + $0x50] sm:$0xff]  ;;  %628 = vst.msk [vmem:[#allocation2 + $0x20] sm:$0xff] %vm623_vm3, %v3387_v61 }
  0x1c   : > { %2569 = vmatmul.msk.bf16.vlgmr.msra.gmra.mxu0 %vm454_vm2, %v3157_v7  ;;  %2584 = vmatmul.msk.bf16.vlgmr.msra.gmra.mxu1 %vm454_vm2, %v3172_v20  ;;  %v3168_v25 = vld [vmem:[%s3497_s29 + $0x58] sm:$0xff]  ;;  %v3169_v29 = vld [vmem:[%s3497_s29 + $0x60] sm:$0xff]  ;;  %v3170_v35 = vld [vmem:[%s3497_s29 + $0x68] sm:$0xff]  ;;  %629 = vst.msk [vmem:[#allocation2 + $0x28] sm:$0xff] %vm623_vm3, %v3387_v61 }
  0x1d   : > { %v3171_v44 = vld [vmem:[%s3497_s29 + $0x70] sm:$0xff]  ;;  %630 = vst.msk [vmem:[#allocation2 + $0x30] sm:$0xff] %vm623_vm3, %v3387_v61  ;;  %764 = vmatpush.bf16.msrb.mxu1 %v3177_v1  ;;  %818 = vmatpush.bf16.msra.mxu2 %v3174_v5  ;;  %s2436_s29 = scalar_lea.hbm %s4405_s9, %s3459_s13  ;;  %s3342_s13 = scalar_lea.hbm %s4405_s9, 2 }
  0x1e   : > { %631 = vst.msk [vmem:[#allocation2 + $0x38] sm:$0xff] %vm623_vm3, %v3387_v61  ;;  %s2440_s17 = sshll.u32 %s2436_s29, 4  ;;  %s2441_s17 = int_to_ptr.hbm [resolvable:$true] %s2440_s17 }
  0x1f   : > { %633 = vst.msk [vmem:[#allocation2 + $0x48] sm:$0xff] %vm623_vm3, %v3387_v61  ;;  %s3336_s22 = sshra.s32 %s2441_s17, 4  ;;  %s3337_s22 = int_to_ptr.hbm [resolvable:$true] %s3336_s22 }
  0x20   : > { %634 = vst.msk [vmem:[#allocation2 + $0x50] sm:$0xff] %vm623_vm3, %v3387_v61  ;;  %s3338_s23 = scalar_lea.hbm %s3337_s22, 1  ;;  %p3343_p0 = scmp.lt.s32.totalorder %s3337_s22, %s4405_s9 }
  0x21   : > { %635 = vst.msk [vmem:[#allocation2 + $0x58] sm:$0xff] %vm623_vm3, %v3387_v61  ;;  %765 = vmatpush.bf16.msrb.mxu1 %v3176_v4  ;;  %p3339_p11 = scmp.ne.s32.totalorder %s3337_s22, %s3338_s23  ;;  %p3344_p1 = scmp.lt.s32.totalorder %s3342_s13, %s3338_s23 }
  0x23   : > { %p3340_p12 = pnand %p3339_p11, %p3476_p5  ;;  %p3345_p2 = por %p3344_p1, %p3343_p0 }
  0x25   : > { %p3341_p13 = pneg %p3340_p12 }
  0x27   : > { %p3346_p3 = pnand %p3345_p2, %p3341_p13 }
  0x2c   : > { %2570 = vmatmul.msk.bf16.gmra.mxu0 %vm454_vm2, %v3158_v8 }
  0x3c   : > { %2571 = vmatmul.msk.bf16.gmra.mxu0 %vm454_vm2, %v3159_v9  ;;  %v3179_v9 = vld [vmem:[%s4399_s3 + $0x28] sm:$0xff] }
  0x3d   : > { %911 = vmatpush.bf16.msra.mxu3 %v3179_v9  ;;  %v3185_v9 = vld [vmem:[%s4399_s3 + $0x58] sm:$0xff] }
  0x4c   : > { %2572 = vmatmul.msk.bf16.gmra.mxu0 %vm454_vm2, %v3160_v10 }
  0x5c   : > { %2573 = vmatmul.msk.bf16.gmra.mxu0 %vm454_vm2, %v3161_v11 }
  0x6c   : > { %2574 = vmatmul.msk.bf16.gmra.mxu0 %vm454_vm2, %v3162_v12  ;;  %v644_v12 = vlaneseq }
  0x7c   : > { %2575 = vmatmul.msk.bf16.gmra.mxu0 %vm454_vm2, %v3163_v13 }
  0x8c   : > { %2576 = vmatmul.msk.bf16.gmra.mxu0 %vm454_vm2, %v3164_v14  ;;  %v3178_v14 = vld [vmem:[%s4399_s3 + $0x20] sm:$0xff] }
  0x8d   : > { %912 = vmatpush.bf16.msra.mxu3 %v3178_v14 }
  0x91   : > { %1161 = vmatpush.bf16.msrb.mxu3 %v3185_v9 }
  0x99   : > { %v519_v16 = vpop.f32.mrf.mxu0  ;;  %v594_v3 = vpop.f32.mrf.mxu1 }
  0x9a   : > { %v3536_v31 = vadd.f32 %v3532_v28, %v519_v16  ;;  %v595_v6 = vadd.f32 %v3532_v28, %v594_v3 }
  0x9c   : > { %2577 = vmatmul.msk.bf16.gmra.mxu0 %vm454_vm2, %v3165_v15 }
  0xa1   : > { %v3517_v17 = vpop.f32.mrf.mxu0  ;;  %v596_v11 = vpop.f32.mrf.mxu1 }
  0xa2   : > { %v597_v16 = vadd.f32 %v3532_v28, %v596_v11 }
  0xa9   : > { %v524_v19 = vpop.f32.mrf.mxu0 }
  0xaa   : > { %v3548_v37 = vadd.f32 %v3532_v28, %v524_v19  ;;  %v3629_v19 = vshrl.u32 %v644_v12, 7 }
  0xac   : > { %2578 = vmatmul.msk.bf16.gmra.mxu0 %vm454_vm2, %v3166_v18  ;;  %v653_v1 = vand.u32 7, %v3629_v19 }
  0xae   : > { %vm3708_vm9 = vcmp.gt.s32.totalorder %v653_v1, 0  ;;  %vm3742_vm11 = vcmp.lt.s32.totalorder %v653_v1, 7 }
  0xb1   : > { %v526_v21 = vpop.f32.mrf.mxu0 }
  0xb2   : > { %v3557_v41 = vadd.f32 %v3532_v28, %v526_v21 }
  0xb9   : > { %v529_v23 = vpop.f32.mrf.mxu0 }
  0xba   : > { %v3566_v46 = vadd.f32 %v3532_v28, %v529_v23 }
  0xbc   : > { %2579 = vmatmul.msk.bf16.gmra.mxu0 %vm454_vm2, %v3167_v22 }
  0xc1   : > { %v531_v24 = vpop.f32.mrf.mxu0 }
  0xc2   : > { %v3575_v50 = vadd.f32 %v3532_v28, %v531_v24  ;;  %v652_v24 = vadd.s32 56, %v3629_v19 }
  0xc9   : > { %v534_v26 = vpop.f32.mrf.mxu0 }
  0xca   : > { %v535_v54 = vadd.f32 %v3532_v28, %v534_v26  ;;  %v3636_v26 = vadd.s32 40, %v3629_v19 }
  0xcc   : > { %2580 = vmatmul.msk.bf16.gmra.mxu0 %vm454_vm2, %v3168_v25 }
  0xd1   : > { %v3527_v27 = vpop.f32.mrf.mxu0 }
  0xd2   : > { %v537_v20 = vadd.f32 %v3532_v28, %v3527_v27  ;;  %v660_v27 = vand.u32 7, %v652_v24 }
  0xd4   : > { %vm3647_vm4 = vcmp.lt.s32.totalorder %v660_v27, 7  ;;  %vm3669_vm8 = vcmp.gt.s32.totalorder %v660_v27, 0 }
  0xd9   : > { %v539_v30 = vpop.f32.mrf.mxu0 }
  0xda   : > { %v3539_v32 = vadd.f32 %v3532_v28, %v539_v30 }
  0xdc   : > { %v599_v33 = vmax.f32 %v3536_v31, %v3539_v32  ;;  %2581 = vmatmul.msk.bf16.gmra.mxu0 %vm454_vm2, %v3169_v29  ;;  %v651_v29 = vadd.s32 48, %v3629_v19 }
  0xe1   : > { %v3544_v34 = vpop.f32.mrf.mxu0 }
  0xe2   : > { %v542_v3 = vadd.f32 %v3532_v28, %v3544_v34 }
  0xe9   : > { %v544_v36 = vpop.f32.mrf.mxu0 }
  0xea   : > { %v3551_v38 = vadd.f32 %v3532_v28, %v544_v36 }
  0xec   : > { %v601_v39 = vmax.f32 %v3548_v37, %v3551_v38  ;;  %2582 = vmatmul.msk.bf16.gmra.mxu0 %vm454_vm2, %v3170_v35  ;;  %v3183_v35 = vld [vmem:[%s4399_s3 + $0x48] sm:$0xff] }
  0xed   : > { %1075 = vmatpush.bf16.msrb.mxu2 %v3183_v35 }
  0xf1   : > { %v546_v40 = vpop.f32.mrf.mxu0 }
  0xf2   : > { %v3560_v42 = vadd.f32 %v3532_v28, %v546_v40 }
  0xf4   : > { %v602_v43 = vmax.f32 %v3557_v41, %v3560_v42 }
  0xf9   : > { %v549_v45 = vpop.f32.mrf.mxu0 }
  0xfa   : > { %v3569_v47 = vadd.f32 %v3532_v28, %v549_v45  ;;  %v659_v45 = vand.u32 7, %v651_v29 }
  0xfc   : > { %v603_v48 = vmax.f32 %v3566_v46, %v3569_v47  ;;  %2583 = vmatmul.msk.bf16.gmra.mxu0 %vm454_vm2, %v3171_v44  ;;  %v658_v44 = vand.u32 7, %v3636_v26  ;;  %vm3660_vm6 = vcmp.gt.s32.totalorder %v659_v45, 0  ;;  %vm3664_vm7 = vcmp.lt.s32.totalorder %v659_v45, 7 }
  0xfe   : > { %vm3656_vm5 = vcmp.lt.s32.totalorder %v658_v44, 7  ;;  %vm3859_vm2 = vcmp.gt.s32.totalorder %v658_v44, 0 }
 0x101   : > { %v551_v49 = vpop.f32.mrf.mxu0 }
 0x102   : > { %v3578_v51 = vadd.f32 %v3532_v28, %v551_v49 }
 0x104   : > { %v604_v52 = vmax.f32 %v3575_v50, %v3578_v51 }
 0x109   : > { %v554_v53 = vpop.f32.mrf.mxu0 }
 0x10a   : > { %v555_v55 = vadd.f32 %v3532_v28, %v554_v53  ;;  %v646_v53 = vadd.s32 8, %v3629_v19 }
 0x10c   : > { %v605_v56 = vmax.f32 %v535_v54, %v555_v55  ;;  %v1363_v55 = vld [vmem:[#allocation2 + $0x51] sm:$0xff]  ;;  %v654_v4 = vand.u32 7, %v646_v53 }
 0x10d   : > { %v3188_v54 = vld [vmem:[%s4399_s3 + $0x70] sm:$0xff] }
 0x10e   : > { %vm3718_vm10 = vcmp.gt.s32.totalorder %v654_v4, 0  ;;  %vm3746_vm12 = vcmp.lt.s32.totalorder %v654_v4, 7 }
 0x111   : > { %v556_v57 = vpop.f32.mrf.mxu0 }
 0x112   : > { %v557_v15 = vadd.f32 %v3532_v28, %v556_v57 }
 0x114   : > { %v606_v22 = vmax.f32 %v537_v20, %v557_v15  ;;  %v677_v20 = vld [vmem:[#allocation2 + $0x7] sm:$0xff] }
 0x115   : > { %v701_v35 = vsel %vm3708_vm9, %v677_v20, 0.0  ;;  %v3184_v20 = vld [vmem:[%s4399_s3 + $0x50] sm:$0xff] }
 0x116   : > { %1162 = vmatpush.bf16.msrb.mxu3 %v3184_v20 }
 0x119   : > { %v559_v58 = vpop.f32.mrf.mxu0 }
 0x11a   : > { %v560_v36 = vadd.f32 %v3532_v28, %v559_v58 }
 0x121   : > { %v3584_v59 = vpop.f32.mrf.mxu0 }
 0x129   : > { %v3586_v60 = vpop.f32.mrf.mxu0 }
 0x131   : > { %v3590_v62 = vpop.f32.mrf.mxu0 }
 0x139   : > { %v3600_v63 = vpop.f32.mrf.mxu0 }
 0x141   : > { %v3604_v0 = vpop.f32.mrf.mxu0 }
 0x142   : > { %v572_v47 = vadd.f32 %v3532_v28, %v3604_v0 }
 0x149   : > { %v574_v7 = vpop.f32.mrf.mxu0 }
 0x14a   : > { %v575_v8 = vadd.f32 %v3532_v28, %v574_v7  ;;  %v1371_v7 = vsel %vm3647_vm4, %v1363_v55, 0.0  ;;  %v565_v55 = vadd.f32 %v3532_v28, %v3586_v60 }
 0x14c   : > { %v613_v10 = vmax.f32 %v575_v8, %v595_v6 }
 0x14e   : > { %v621_v13 = vmax.f32 %v605_v56, %v613_v10 }
 0x150   : > { %642 = vst.msk [vmem:[#allocation2 + $0x40] sm:$0xff] %vm623_vm3, %v621_v13  ;;  %v562_v13 = vadd.f32 %v3532_v28, %v3584_v59 }
 0x151   : > { %v576_v18 = vpop.f32.mrf.mxu0 }
 0x152   : > { %v577_v21 = vadd.f32 %v3532_v28, %v576_v18  ;;  %v3186_v18 = vld [vmem:[%s4399_s3 + $0x60] sm:$0xff] }
 0x154   : > { %v614_v23 = vmax.f32 %v577_v21, %v597_v16 }
 0x156   : > { %v622_v25 = vmax.f32 %v606_v22, %v614_v23 }
 0x158   : > { %643 = vst.msk [vmem:[#allocation2 + $0x48] sm:$0xff] %vm623_vm3, %v622_v25  ;;  %v717_v25 = vld [vmem:[#allocation2 + $0x8] sm:$0xff] }
 0x159   : > { %v579_v30 = vpop.f32.mrf.mxu0 }
 0x15a   : > { %v580_v40 = vadd.f32 %v3532_v28, %v579_v30 }
 0x15c   : > { %v607_v49 = vmax.f32 %v560_v36, %v580_v40 }
 0x15e   : > { %v615_v56 = vmax.f32 %v599_v33, %v607_v49  ;;  %v522_v33 = vadd.f32 %v3532_v28, %v3517_v17  ;;  %v3181_v17 = vld [vmem:[%s4399_s3 + $0x38] sm:$0xff] }
 0x15f   : > { %v3673_v31 = vld [vmem:[#allocation2 + $0x41] sm:$0xff]  ;;  %v1113_v5 = vld [vmem:[#allocation2 + $0x49] sm:$0xff]  ;;  %997 = vmatpush.bf16.msra.mxu1 %v3181_v17 }
 0x160   : > { %v3675_v32 = vld [vmem:[#allocation2 + $0x47] sm:$0xff]  ;;  %636 = vst.msk [vmem:[#allocation2 + $0x10] sm:$0xff] %vm623_vm3, %v615_v56  ;;  %v1199_v6 = vld [vmem:[#allocation2 + $0x4f] sm:$0xff]  ;;  %v1120_v34 = vsel %vm3664_vm7, %v3673_v31, 0.0  ;;  %v1121_v10 = vsel %vm3647_vm4, %v1113_v5, 0.0  ;;  %v1369_v11 = vsel %vm3656_vm5, %v3673_v31, 0.0  ;;  %v600_v59 = vmax.f32 %v522_v33, %v542_v3 }
 0x161   : > { %v581_v8 = vpop.f32.mrf.mxu0  ;;  %v1206_v12 = vsel %vm3660_vm6, %v3675_v32, 0.0  ;;  %v3704_v15 = vpack.c.bf16 %v1121_v10, %v1120_v34  ;;  %v1207_v16 = vsel %vm3669_vm8, %v1199_v6, 0.0  ;;  %v1370_v22 = vsel %vm3664_vm7, %v1113_v5, 0.0  ;;  %v3182_v33 = vld [vmem:[%s4399_s3 + $0x40] sm:$0xff] }
 0x162   : > { %v582_v14 = vadd.f32 %v3532_v28, %v581_v8  ;;  %v3712_v21 = vpack.c.bf16 %v1207_v16, %v1206_v12  ;;  %v3716_v24 = vpack.c.bf16 %v1371_v7, %v1370_v22  ;;  %v647_v5 = vadd.s32 16, %v3629_v19  ;;  %1076 = vmatpush.bf16.msrb.mxu2 %v3182_v33  ;;  %v3180_v22 = vld [vmem:[%s4399_s3 + $0x30] sm:$0xff] }
 0x163   : > { %v648_v8 = vadd.s32 24, %v3629_v19  ;;  %998 = vmatpush.bf16.msra.mxu1 %v3180_v22  ;;  %v871_v57 = vsel %vm3647_vm4, %v3673_v31, 0.0  ;;  %v3190_v31 = vld [vmem:[%s4399_s3 + $0x80] sm:$0xff]  ;;  %v957_v20 = vsel %vm3669_vm8, %v3675_v32, 0.0  ;;  %vm1512_vm4 = vcmask 523264  }
 0x164   : > { %v608_v23 = vmax.f32 %v562_v13, %v582_v14  ;;  %v655_v12 = vand.u32 7, %v647_v5  ;;  %v570_v5 = vadd.f32 %v3532_v28, %v3600_v63  ;;  %v649_v63 = vadd.s32 32, %v3629_v19 }
 0x165   : > { %v656_v37 = vand.u32 7, %v648_v8 }
 0x166   : > { %v616_v30 = vmax.f32 %v600_v59, %v608_v23  ;;  %vm3776_vm13 = vcmp.gt.s32.totalorder %v655_v12, 0  ;;  %vm3821_vm15 = vcmp.lt.s32.totalorder %v655_v12, 7  ;;  %v657_v46 = vand.u32 7, %v649_v63  ;;  %v3243_v23 = vld [vmem:[%s4401_s5 + $0x198] sm:$0xff] }
 0x167   : > { %v3724_v27 = vld [vmem:[#allocation2 + $0x10] sm:$0xff]  ;;  %vm3780_vm14 = vcmp.gt.s32.totalorder %v656_v37, 0  ;;  %vm3825_vm0 = vcmp.lt.s32.totalorder %v656_v37, 7  ;;  %2164 = vmatpush.bf16.msrb.mxu0 %v3243_v23 }
 0x168   : > { %v3726_v36 = vld [vmem:[#allocation2 + $0xf] sm:$0xff]  ;;  %637 = vst.msk [vmem:[#allocation2 + $0x18] sm:$0xff] %vm623_vm3, %v616_v30  ;;  %v725_v40 = vpack.c.bf16 %v3724_v27, %v717_v25  ;;  %vm3853_vm1 = vcmp.gt.s32.totalorder %v657_v46, 0 }
 0x169   : > { %v702_v45 = vsel %vm3718_vm10, %v3726_v36, 0.0  ;;  %v584_v49 = vpop.f32.mrf.mxu0  ;;  %v840_v60 = vld [vmem:[#allocation2 + $0x9] sm:$0xff] }
 0x16a   : > { %v709_v53 = vpack.c.bf16 %v702_v45, %v701_v35  ;;  %v585_v56 = vadd.f32 %v3532_v28, %v584_v49  ;;  %2597 = vmatmul.msk.bf16.vlgmr.msrb.gmra.mxu1 %vm623_vm3, %v725_v40  ;;  %v864_v4 = vsel %vm3742_vm11, %v840_v60, 0.0 }
 0x16c   : > { %2609 = vmatmul.msk.bf16.vlgmr.msra.gmra.mxu2 %vm623_vm3, %v709_v53  ;;  %v609_v3 = vmax.f32 %v565_v55, %v585_v56 }
 0x16e   : > { %v617_v9 = vmax.f32 %v601_v39, %v609_v3  ;;  %v567_v39 = vadd.f32 %v3532_v28, %v3590_v62 }
 0x16f   : > { %v3754_v17 = vld [vmem:[#allocation2 + $0x17] sm:$0xff] }
 0x170   : > { %v841_v34 = vld [vmem:[#allocation2 + $0x11] sm:$0xff]  ;;  %638 = vst.msk [vmem:[#allocation2 + $0x20] sm:$0xff] %vm623_vm3, %v617_v9  ;;  %v1200_v1 = vsel %vm3708_vm9, %v3754_v17, 0.0  ;;  %v703_v49 = vsel %vm3776_vm13, %v3754_v17, 0.0 }
 0x171   : > { %v865_v10 = vsel %vm3746_vm12, %v841_v34, 0.0  ;;  %v586_v13 = vpop.f32.mrf.mxu0  ;;  %v1114_v38 = vsel %vm3742_vm11, %v841_v34, 0.0  ;;  %v3787_v30 = vld [vmem:[#allocation2 + $0x18] sm:$0xff] }
 0x172   : > { %v872_v14 = vpack.c.bf16 %v865_v10, %v864_v4  ;;  %v587_v16 = vadd.f32 %v3532_v28, %v586_v13  ;;  %v1036_v61 = vpack.c.bf16 %v3787_v30, %v3724_v27 }
 0x174   : > { %2625 = vmatmul.msk.bf16.vlgmr.msra.gmra.mxu3 %vm623_vm3, %v872_v14  ;;  %v610_v59 = vmax.f32 %v567_v39, %v587_v16 }
 0x176   : > { %v618_v62 = vmax.f32 %v602_v43, %v610_v59 }
 0x177   : > { %v3789_v35 = vld [vmem:[#allocation2 + $0x1f] sm:$0xff] }
 0x178   : > { %v1356_v40 = vld [vmem:[#allocation2 + $0x19] sm:$0xff]  ;;  %v1201_v53 = vsel %vm3718_vm10, %v3789_v35, 0.0  ;;  %639 = vst.msk [vmem:[#allocation2 + $0x28] sm:$0xff] %vm623_vm3, %v618_v62  ;;  %v704_v43 = vsel %vm3780_vm14, %v3789_v35, 0.0  ;;  %v952_v27 = vsel %vm3776_vm13, %v3789_v35, 0.0 }
 0x179   : > { %v3791_v45 = vld [vmem:[#allocation2 + $0x20] sm:$0xff]  ;;  %v1364_v41 = vsel %vm3742_vm11, %v1356_v40, 0.0  ;;  %v3809_v55 = vpack.c.bf16 %v1201_v53, %v1200_v1  ;;  %v589_v56 = vpop.f32.mrf.mxu0  ;;  %v710_v33 = vpack.c.bf16 %v704_v43, %v703_v49  ;;  %v1115_v3 = vsel %vm3746_vm12, %v1356_v40, 0.0 }
 0x17a   : > { %v3804_v42 = vpack.c.bf16 %v3791_v45, %v3787_v30  ;;  %v590_v6 = vadd.f32 %v3532_v28, %v589_v56  ;;  %v3818_v60 = vpack.c.bf16 %v1115_v3, %v1114_v38  ;;  %v866_v12 = vsel %vm3821_vm15, %v1356_v40, 0.0  ;;  %v3189_v56 = vld [vmem:[%s4399_s3 + $0x78] sm:$0xff] }
 0x17b   : > { %vm3898_vm11 = vcmp.lt.s32.totalorder %v657_v46, 7  ;;  %1325 = vmatpush.bf16.msra.mxu2 %v3189_v56 }
 0x17c   : > { %2598 = vmatmul.msk.bf16.gmra.mxu1 %vm623_vm3, %v3804_v42  ;;  %2610 = vmatmul.msk.bf16.gmra.mxu2 %vm623_vm3, %v710_v33  ;;  %v611_v8 = vmax.f32 %v570_v5, %v590_v6 }
 0x17e   : > { %v619_v1 = vmax.f32 %v603_v48, %v611_v8 }
 0x17f   : > { %v1357_v4 = vld [vmem:[#allocation2 + $0x21] sm:$0xff]  ;;  %1326 = vmatpush.bf16.msra.mxu2 %v3188_v54  ;;  %v3199_v54 = vld [vmem:[%s4401_s5 + $0x38] sm:$0xff] }
 0x180   : > { %v3833_v10 = vld [vmem:[#allocation2 + $0x27] sm:$0xff]  ;;  %v1365_v13 = vsel %vm3746_vm12, %v1357_v4, 0.0  ;;  %640 = vst.msk [vmem:[#allocation2 + $0x30] sm:$0xff] %vm623_vm3, %v619_v1  ;;  %v867_v14 = vsel %vm3825_vm0, %v1357_v4, 0.0  ;;  %v1116_v7 = vsel %vm3821_vm15, %v1357_v4, 0.0 }
 0x181   : > { %v3842_v37 = vpack.c.bf16 %v1365_v13, %v1364_v41  ;;  %v591_v19 = vpop.f32.mrf.mxu0  ;;  %v873_v38 = vpack.c.bf16 %v867_v14, %v866_v12  ;;  %v1202_v39 = vsel %vm3776_vm13, %v3833_v10, 0.0  ;;  %v3866_v22 = vld [vmem:[#allocation2 + $0x28] sm:$0xff]  ;;  %v705_v44 = vsel %vm3853_vm1, %v3833_v10, 0.0 }
 0x182   : > { %v592_v48 = vadd.f32 %v3532_v28, %v591_v19  ;;  %v3191_v13 = vld [vmem:[%s4399_s3 + $0x88] sm:$0xff]  ;;  %v953_v29 = vsel %vm3780_vm14, %v3833_v10, 0.0 }
 0x183   : > { %v3187_v12 = vld [vmem:[%s4399_s3 + $0x68] sm:$0xff]  ;;  %1411 = vmatpush.bf16.msra.mxu3 %v3191_v13 }
 0x184   : > { %2626 = vmatmul.msk.bf16.gmra.mxu3 %vm623_vm3, %v873_v38  ;;  %v612_v16 = vmax.f32 %v572_v47, %v592_v48  ;;  %1247 = vmatpush.bf16.msrb.mxu1 %v3187_v12  ;;  %v1035_v10 = vld [vmem:[#allocation2 + $0x48] sm:$0xff] }
 0x186   : > { %v620_v28 = vmax.f32 %v604_v52, %v612_v16 }
 0x187   : > { %v3868_v59 = vld [vmem:[#allocation2 + $0x30] sm:$0xff]  ;;  %1412 = vmatpush.bf16.msra.mxu3 %v3190_v31 }
 0x188   : > { %v3870_v62 = vld [vmem:[#allocation2 + $0x2f] sm:$0xff]  ;;  %641 = vst.msk [vmem:[#allocation2 + $0x38] sm:$0xff] %vm623_vm3, %v620_v28  ;;  %v3875_v26 = vpack.c.bf16 %v3868_v59, %v3866_v22  ;;  %1248 = vmatpush.bf16.msrb.mxu1 %v3186_v18 }
 0x189   : > { %v844_v40 = vld [vmem:[#allocation2 + $0x29] sm:$0xff]  ;;  %v706_v50 = vsel %vm3859_vm2, %v3870_v62, 0.0  ;;  %v1203_v53 = vsel %vm3780_vm14, %v3870_v62, 0.0  ;;  %v954_v30 = vsel %vm3853_vm1, %v3870_v62, 0.0 }
 0x18a   : > { %v1117_v51 = vsel %vm3825_vm0, %v844_v40, 0.0  ;;  %v711_v52 = vpack.c.bf16 %v706_v50, %v705_v44  ;;  %v3890_v41 = vpack.c.bf16 %v1203_v53, %v1202_v39  ;;  %v1366_v43 = vsel %vm3821_vm15, %v844_v40, 0.0  ;;  %v724_v44 = vld [vmem:[#allocation2 + $0x40] sm:$0xff] }
 0x18b   : > { %v1123_v49 = vpack.c.bf16 %v1117_v51, %v1116_v7  ;;  %v868_v5 = vsel %vm3898_vm11, %v844_v40, 0.0 }
 0x18c   : > { %2599 = vmatmul.msk.bf16.gmra.mxu1 %vm623_vm3, %v3875_v26  ;;  %2611 = vmatmul.msk.bf16.gmra.mxu2 %vm623_vm3, %v711_v52 }
 0x18f   : > { %v845_v3 = vld [vmem:[#allocation2 + $0x31] sm:$0xff]  ;;  %v846_v9 = vld [vmem:[#allocation2 + $0x39] sm:$0xff] }
 0x190   : > { %v869_v6 = vsel %vm3656_vm5, %v845_v3, 0.0  ;;  %v683_v8 = vld [vmem:[#allocation2 + $0x37] sm:$0xff]  ;;  %v684_v1 = vld [vmem:[#allocation2 + $0x3f] sm:$0xff]  ;;  %v1118_v4 = vsel %vm3898_vm11, %v845_v3, 0.0  ;;  %v1119_v14 = vsel %vm3656_vm5, %v846_v9, 0.0  ;;  %v1367_v19 = vsel %vm3825_vm0, %v845_v3, 0.0 }
 0x191   : > { %v874_v63 = vpack.c.bf16 %v869_v6, %v868_v5  ;;  %v1204_v38 = vsel %vm3853_vm1, %v683_v8, 0.0  ;;  %v1124_v46 = vpack.c.bf16 %v1119_v14, %v1118_v4  ;;  %v3921_v47 = vpack.c.bf16 %v1367_v19, %v1366_v43  ;;  %v723_v7 = vld [vmem:[#allocation2 + $0x38] sm:$0xff]  ;;  %v1285_v14 = vld [vmem:[#allocation2 + $0x50] sm:$0xff] }
 0x192   : > { %v1205_v48 = vsel %vm3859_vm2, %v684_v1, 0.0  ;;  %v1368_v16 = vsel %vm3898_vm11, %v846_v9, 0.0  ;;  %v707_v34 = vsel %vm3660_vm6, %v683_v8, 0.0  ;;  %v708_v28 = vsel %vm3669_vm8, %v684_v1, 0.0 }
 0x193   : > { %v3925_v39 = vpack.c.bf16 %v1205_v48, %v1204_v38  ;;  %v3937_v40 = vpack.c.bf16 %v1369_v11, %v1368_v16  ;;  %v3939_v50 = vpack.c.bf16 %v724_v44, %v723_v7  ;;  %v712_v51 = vpack.c.bf16 %v708_v28, %v707_v34 }
 0x194   : > { %2627 = vmatmul.msk.bf16.gmra.mxu3 %vm623_vm3, %v874_v63  ;;  %v870_v52 = vsel %vm3664_vm7, %v846_v9, 0.0  ;;  %v951_v11 = vsel %vm3718_vm10, %v3754_v17, 0.0  ;;  %v950_v43 = vsel %vm3708_vm9, %v3726_v36, 0.0  ;;  %v959_v36 = vpack.c.bf16 %v953_v29, %v952_v27 }
 0x195   : > { %v875_v53 = vpack.c.bf16 %v871_v57, %v870_v52  ;;  %v958_v56 = vpack.c.bf16 %v951_v11, %v950_v43  ;;  %v1037_v17 = vpack.c.bf16 %v3866_v22, %v3791_v45  ;;  %v955_v25 = vsel %vm3859_vm2, %v683_v8, 0.0 }
 0x196   : > { %v960_v35 = vpack.c.bf16 %v955_v25, %v954_v30  ;;  %v1038_v45 = vpack.c.bf16 %v723_v7, %v3868_v59  ;;  %v1039_v22 = vpack.c.bf16 %v1035_v10, %v724_v44  ;;  %vm2414_vm9 = vcmask 73728  }
 0x19c   : > { %2600 = vmatmul.msk.bf16.gmra.mxu1 %vm623_vm3, %v3939_v50  ;;  %2612 = vmatmul.msk.bf16.gmra.mxu2 %vm623_vm3, %v712_v51 }
 0x1a4   : > { %2628 = vmatmul.msk.bf16.gmra.mxu3 %vm623_vm3, %v875_v53 }
 0x1ac   : > { %2641 = vmatmul.msk.bf16.vlgmr.msra.gmra.mxu1 %vm623_vm3, %v958_v56  ;;  %2657 = vmatmul.msk.bf16.vlgmr.msrb.gmra.mxu2 %vm623_vm3, %v1036_v61  ;;  %v3203_v61 = vld [vmem:[%s4401_s5 + $0x58] sm:$0xff] }
 0x1ad   : > { %1520 = vmatpush.bf16.msra.mxu1 %v3199_v54 }
 0x1b4   : > { %2673 = vmatmul.msk.bf16.vlgmr.msrb.gmra.mxu3 %vm623_vm3, %v3818_v60  ;;  %v956_v60 = vsel %vm3660_vm6, %v684_v1, 0.0 }
 0x1b5   : > { %v961_v0 = vpack.c.bf16 %v957_v20, %v956_v60  ;;  %1610 = vmatpush.bf16.msrb.mxu3 %v3203_v61  ;;  %v3202_v60 = vld [vmem:[%s4401_s5 + $0x50] sm:$0xff]  ;;  %v3211_v61 = vld [vmem:[%s4401_s5 + $0x98] sm:$0xff] }
 0x1b9   : > { %1611 = vmatpush.bf16.msrb.mxu3 %v3202_v60 }
 0x1bc   : > { %2642 = vmatmul.msk.bf16.gmra.mxu1 %vm623_vm3, %v959_v36  ;;  %2658 = vmatmul.msk.bf16.gmra.mxu2 %vm623_vm3, %v1037_v17  ;;  %v3241_v36 = vld [vmem:[%s4401_s5 + $0x188] sm:$0xff] }
 0x1c4   : > { %2674 = vmatmul.msk.bf16.gmra.mxu3 %vm623_vm3, %v1123_v49 }
 0x1cc   : > { %2643 = vmatmul.msk.bf16.gmra.mxu1 %vm623_vm3, %v960_v35  ;;  %2659 = vmatmul.msk.bf16.gmra.mxu2 %vm623_vm3, %v1038_v45  ;;  %v3194_v45 = vld [vmem:[%s4401_s5 + $0x10] sm:$0xff] }
 0x1d4   : > { %2675 = vmatmul.msk.bf16.gmra.mxu3 %vm623_vm3, %v1124_v46  ;;  %v1289_v46 = vpack.c.bf16 %v1285_v14, %v1035_v10  ;;  %v3198_v10 = vld [vmem:[%s4401_s5 + $0x30] sm:$0xff] }
 0x1d5   : > { %1521 = vmatpush.bf16.msra.mxu1 %v3198_v10 }
 0x1dc   : > { %2644 = vmatmul.msk.bf16.gmra.mxu1 %vm623_vm3, %v961_v0  ;;  %2660 = vmatmul.msk.bf16.gmra.mxu2 %vm623_vm3, %v1039_v22 }
 0x1e4   : > { %2676 = vmatmul.msk.bf16.gmra.mxu3 %vm623_vm3, %v3704_v15 }
 0x1e7   : > { %v767_v59 = vpop.f32.mrf.mxu1 }
 0x1ec   : > { %2689 = vmatmul.msk.bf16.vlgmr.msrb.gmra.mxu1 %vm623_vm3, %v3809_v55  ;;  %2705 = vmatmul.msk.bf16.vlgmr.msra.gmra.mxu2 %vm623_vm3, %v3804_v42 }
 0x1ef   : > { %v820_v58 = vpop.f32.mrf.mxu2  ;;  %v4007_v2 = vpop.f32.mrf.mxu1 }
 0x1f0   : > { %v821_v62 = vadd.f32 %v820_v58, %v767_v59 }
 0x1f4   : > { %2721 = vmatmul.msk.bf16.vlgmr.msra.gmra.mxu3 %vm623_vm3, %v3842_v37  ;;  %v3242_v37 = vld [vmem:[%s4401_s5 + $0x190] sm:$0xff] }
 0x1f5   : > { %2165 = vmatpush.bf16.msrb.mxu0 %v3242_v37  ;;  %v3197_v37 = vld [vmem:[%s4401_s5 + $0x28] sm:$0xff] }
 0x1f6   : > { %1522 = vmatpush.bf16.msra.mxu1 %v3197_v37  ;;  %v3240_v37 = vld [vmem:[%s4401_s5 + $0x180] sm:$0xff] }
 0x1f7   : > { %v4011_v32 = vpop.f32.mrf.mxu2  ;;  %v914_v49 = vpop.f32.mrf.mxu3 }
 0x1f8   : > { %v934_v33 = vadd.f32 %v914_v49, %v821_v62 }
 0x1f9   : > { %v772_v3 = vpop.f32.mrf.mxu1  ;;  %2166 = vmatpush.bf16.msrb.mxu0 %v3241_v36 }
 0x1fc   : > { %2690 = vmatmul.msk.bf16.gmra.mxu1 %vm623_vm3, %v3890_v41  ;;  %2706 = vmatmul.msk.bf16.gmra.mxu2 %vm623_vm3, %v3875_v26 }
 0x1fd   : > { %2167 = vmatpush.bf16.msrb.mxu0 %v3240_v37 }
 0x1ff   : > { %v825_v15 = vpop.f32.mrf.mxu2  ;;  %v4017_v42 = vpop.f32.mrf.mxu3 }
 0x200   : > { %v826_v55 = vadd.f32 %v825_v15, %v772_v3  ;;  %v3193_v15 = vld [vmem:[%s4401_s5 + $0x8] sm:$0xff] }
 0x201   : > { %v4019_v5 = vpop.f32.mrf.mxu1 }
 0x204   : > { %2722 = vmatmul.msk.bf16.gmra.mxu3 %vm623_vm3, %v3921_v47 }
 0x207   : > { %v4026_v6 = vpop.f32.mrf.mxu2  ;;  %v919_v41 = vpop.f32.mrf.mxu3 }
 0x208   : > { %v936_v8 = vadd.f32 %v919_v41, %v826_v55  ;;  %v3201_v55 = vld [vmem:[%s4401_s5 + $0x48] sm:$0xff] }
 0x209   : > { %v777_v9 = vpop.f32.mrf.mxu1  ;;  %1612 = vmatpush.bf16.msrb.mxu3 %v3201_v55 }
 0x20c   : > { %2691 = vmatmul.msk.bf16.gmra.mxu1 %vm623_vm3, %v3925_v39  ;;  %2707 = vmatmul.msk.bf16.gmra.mxu2 %vm623_vm3, %v3939_v50 }
 0x20f   : > { %v830_v26 = vpop.f32.mrf.mxu2  ;;  %v4032_v63 = vpop.f32.mrf.mxu3 }
 0x210   : > { %v831_v1 = vadd.f32 %v830_v26, %v777_v9 }
 0x211   : > { %v4034_v4 = vpop.f32.mrf.mxu1 }
 0x214   : > { %2723 = vmatmul.msk.bf16.gmra.mxu3 %vm623_vm3, %v3937_v40 }
 0x217   : > { %v4038_v13 = vpop.f32.mrf.mxu2  ;;  %v924_v12 = vpop.f32.mrf.mxu3 }
 0x218   : > { %v938_v19 = vadd.f32 %v924_v12, %v831_v1 }
 0x219   : > { %v782_v38 = vpop.f32.mrf.mxu1 }
 0x21c   : > { %2692 = vmatmul.msk.bf16.gmra.mxu1 %vm623_vm3, %v3712_v21  ;;  %2708 = vmatmul.msk.bf16.gmra.mxu2 %vm623_vm3, %v1289_v46 }
 0x21f   : > { %v835_v47 = vpop.f32.mrf.mxu2  ;;  %v4043_v48 = vpop.f32.mrf.mxu3 }
 0x220   : > { %v836_v7 = vadd.f32 %v835_v47, %v782_v38 }
 0x221   : > { %v4045_v39 = vpop.f32.mrf.mxu1 }
 0x224   : > { %2724 = vmatmul.msk.bf16.gmra.mxu3 %vm623_vm3, %v3716_v24  ;;  %v3195_v24 = vld [vmem:[%s4401_s5 + $0x18] sm:$0xff] }
 0x225   : > { %1560 = vmatpush.bf16.msrb.mxu2 %v3195_v24 }
 0x227   : > { %v4049_v16 = vpop.f32.mrf.mxu2  ;;  %v929_v34 = vpop.f32.mrf.mxu3 }
 0x228   : > { %v940_v28 = vadd.f32 %v929_v34, %v836_v7  ;;  %v823_v7 = vadd.f32 %v4011_v32, %v4007_v2 }
 0x229   : > { %v1000_v40 = vpop.f32.mrf.mxu1  ;;  %1561 = vmatpush.bf16.msrb.mxu2 %v3194_v45  ;;  %v828_v45 = vadd.f32 %v4026_v6, %v4019_v5  ;;  %v3209_v5 = vld [vmem:[%s4401_s5 + $0x88] sm:$0xff] }
 0x22a   : > { %v1020_v44 = vadd.f32 %v1000_v40, %v934_v33  ;;  %v935_v34 = vadd.f32 %v4017_v42, %v823_v7 }
 0x22d   : > { %1562 = vmatpush.bf16.msrb.mxu2 %v3193_v15 }
 0x22f   : > { %v4051_v50 = vpop.f32.mrf.mxu3  ;;  %v1078_v21 = vpop.f32.mrf.mxu2 }
 0x230   : > { %v1098_v51 = vadd.f32 %v1078_v21, %v1020_v44  ;;  %v3192_v44 = vld [vmem:[%s4401_s5] sm:$0xff] }
 0x231   : > { %v1002_v52 = vpop.f32.mrf.mxu1  ;;  %v3200_v21 = vld [vmem:[%s4401_s5 + $0x40] sm:$0xff]  ;;  %1563 = vmatpush.bf16.msrb.mxu2 %v3192_v44 }
 0x232   : > { %1613 = vmatpush.bf16.msrb.mxu3 %v3200_v21 }
 0x235   : > { %1726 = vmatpush.bf16.msra.mxu2 %v3211_v61 }
 0x237   : > { %v4053_v57 = vpop.f32.mrf.mxu2  ;;  %v1164_v53 = vpop.f32.mrf.mxu3 }
 0x238   : > { %v1184_v11 = vadd.f32 %v1164_v53, %v1098_v51  ;;  %v3196_v51 = vld [vmem:[%s4401_s5 + $0x20] sm:$0xff] }
 0x239   : > { %v1005_v43 = vpop.f32.mrf.mxu1  ;;  %1523 = vmatpush.bf16.msra.mxu1 %v3196_v51 }
 0x23a   : > { %v1022_v56 = vadd.f32 %v1005_v43, %v936_v8 }
 0x23f   : > { %v1083_v31 = vpop.f32.mrf.mxu2  ;;  %v1166_v18 = vpop.f32.mrf.mxu3 }
 0x240   : > { %v1100_v29 = vadd.f32 %v1083_v31, %v1022_v56  ;;  %v4125_v56 = vld [vmem:[%s4400_s4] ss:$0 sm:$0xff]  ;;  %v3215_v31 = vld [vmem:[%s4401_s5 + $0xb8] sm:$0xff] }
 0x241   : > { %v4064_v27 = vpop.f32.mrf.mxu1  ;;  %1778 = vmatpush.bf16.msra.mxu3 %v3215_v31 }
 0x247   : > { %v4069_v17 = vpop.f32.mrf.mxu2  ;;  %v1169_v25 = vpop.f32.mrf.mxu3 }
 0x248   : > { %v4071_v30 = vadd.f32 %v1169_v25, %v1100_v29 }
 0x249   : > { %v1010_v23 = vpop.f32.mrf.mxu1 }
 0x24a   : > { %v1024_v35 = vadd.f32 %v1010_v23, %v938_v19  ;;  %v3210_v23 = vld [vmem:[%s4401_s5 + $0x90] sm:$0xff] }
 0x24b   : > { %1727 = vmatpush.bf16.msra.mxu2 %v3210_v23  ;;  %v3219_v23 = vld [vmem:[%s4401_s5 + $0xd8] sm:$0xff] }
 0x24f   : > { %v1088_v20 = vpop.f32.mrf.mxu2  ;;  %v4082_v0 = vpop.f32.mrf.mxu3  ;;  %1728 = vmatpush.bf16.msra.mxu2 %v3209_v5 }
 0x250   : > { %v1102_v22 = vadd.f32 %v1088_v20, %v1024_v35  ;;  %v3214_v20 = vld [vmem:[%s4401_s5 + $0xb0] sm:$0xff] }
 0x251   : > { %v4084_v59 = vpop.f32.mrf.mxu1  ;;  %1779 = vmatpush.bf16.msra.mxu3 %v3214_v20  ;;  %v3222_v20 = vld [vmem:[%s4401_s5 + $0xf0] sm:$0xff] }
 0x257   : > { %v4086_v58 = vpop.f32.mrf.mxu2  ;;  %v1174_v62 = vpop.f32.mrf.mxu3 }
 0x258   : > { %v4088_v49 = vadd.f32 %v1174_v62, %v1102_v22  ;;  %v3206_v22 = vld [vmem:[%s4401_s5 + $0x70] sm:$0xff]  ;;  %v937_v62 = vadd.f32 %v4032_v63, %v828_v45  ;;  %v3213_v63 = vld [vmem:[%s4401_s5 + $0xa8] sm:$0xff] }
 0x259   : > { %v1015_v33 = vpop.f32.mrf.mxu1  ;;  %1780 = vmatpush.bf16.msra.mxu3 %v3213_v63  ;;  %v3217_v63 = vld [vmem:[%s4401_s5 + $0xc8] sm:$0xff] }
 0x25a   : > { %v1026_v3 = vadd.f32 %v1015_v33, %v940_v28  ;;  %v1021_v28 = vadd.f32 %v1002_v52, %v935_v34  ;;  %v1023_v6 = vadd.f32 %v4064_v27, %v937_v62 }
 0x25c   : > { %v1099_v2 = vadd.f32 %v4053_v57, %v1021_v28  ;;  %v1101_v27 = vadd.f32 %v4069_v17, %v1023_v6  ;;  %v3212_v28 = vld [vmem:[%s4401_s5 + $0xa0] sm:$0xff]  ;;  %v3226_v6 = vld [vmem:[%s4401_s5 + $0x110] sm:$0xff] }
 0x25d   : > { %v3204_v17 = vld [vmem:[%s4401_s5 + $0x60] sm:$0xff]  ;;  %1781 = vmatpush.bf16.msra.mxu3 %v3212_v28 }
 0x25e   : > { %v1185_v52 = vadd.f32 %v1166_v18, %v1099_v2  ;;  %v3207_v18 = vld [vmem:[%s4401_s5 + $0x78] sm:$0xff]  ;;  %v833_v2 = vadd.f32 %v4038_v13, %v4034_v4  ;;  %v3216_v28 = vld [vmem:[%s4401_s5 + $0xc0] sm:$0xff] }
 0x25f   : > { %v1093_v41 = vpop.f32.mrf.mxu2  ;;  %v4099_v8 = vpop.f32.mrf.mxu3  ;;  %1661 = vmatpush.bf16.msrb.mxu1 %v3207_v18  ;;  %v3223_v18 = vld [vmem:[%s4401_s5 + $0xf8] sm:$0xff] }
 0x260   : > { %v1104_v9 = vadd.f32 %v1093_v41, %v1026_v3  ;;  %v3205_v41 = vld [vmem:[%s4401_s5 + $0x68] sm:$0xff] }
 0x261   : > { %v4101_v26 = vpop.f32.mrf.mxu1 }
 0x263   : > { %1662 = vmatpush.bf16.msrb.mxu1 %v3206_v22 }
 0x267   : > { %v4103_v1 = vpop.f32.mrf.mxu2  ;;  %v1179_v12 = vpop.f32.mrf.mxu3  ;;  %1663 = vmatpush.bf16.msrb.mxu1 %v3205_v41 }
 0x268   : > { %v4105_v14 = vadd.f32 %v1179_v12, %v1104_v9 }
 0x269   : > { %v1250_v19 = vpop.f32.mrf.mxu1 }
 0x26a   : > { %v1270_v40 = vadd.f32 %v1250_v19, %v1184_v11 }
 0x26b   : > { %1664 = vmatpush.bf16.msrb.mxu1 %v3204_v17 }
 0x26f   : > { %v4107_v38 = vpop.f32.mrf.mxu3  ;;  %v1328_v46 = vpop.f32.mrf.mxu2 }
 0x270   : > { %v1348_v32 = vadd.f32 %v1328_v46, %v1270_v40  ;;  %v3208_v46 = vld [vmem:[%s4401_s5 + $0x80] sm:$0xff] }
 0x271   : > { %v1252_v47 = vpop.f32.mrf.mxu1  ;;  %1729 = vmatpush.bf16.msra.mxu2 %v3208_v46 }
 0x272   : > { %v1271_v24 = vadd.f32 %v1252_v47, %v1185_v52  ;;  %v1187_v47 = vadd.f32 %v4082_v0, %v1101_v27 }
 0x277   : > { %v1330_v53 = vpop.f32.mrf.mxu2  ;;  %v1414_v43 = vpop.f32.mrf.mxu3 }
 0x278   : > { %v1434_v11 = vadd.f32 %v1414_v43, %v1348_v32  ;;  %v1349_v54 = vadd.f32 %v1330_v53, %v1271_v24 }
 0x279   : > { %v1255_v42 = vpop.f32.mrf.mxu1 }
 0x27a   : > { %v1446_v57 = vadd.f32 %v4125_v56, %v1434_v11  ;;  %v1272_v15 = vadd.f32 %v1255_v42, %v4071_v30  ;;  %v939_v11 = vadd.f32 %v4043_v48, %v833_v2 }
 0x27c   : > { %v1455_v60 = vrot.slane %v1446_v57, 1 }
 0x27e   : > { %v1457_v3 = vmax.f32 %v1446_v57, %v1455_v60 }
 0x27f   : > { %v1333_v29 = vpop.f32.mrf.mxu2  ;;  %v1416_v36 = vpop.f32.mrf.mxu3 }
 0x280   : > { %v1435_v25 = vadd.f32 %v1416_v36, %v1349_v54  ;;  %v1350_v19 = vadd.f32 %v1333_v29, %v1272_v15  ;;  %v1025_v54 = vadd.f32 %v4084_v59, %v939_v11  ;;  %v3234_v11 = vld [vmem:[%s4401_s5 + $0x150] sm:$0xff] }
 0x281   : > { %v1257_v35 = vpop.f32.mrf.mxu1 }
 0x282   : > { %v1447_v10 = vadd.f32 %v4125_v56, %v1435_v25  ;;  %v1273_v44 = vadd.f32 %v1257_v35, %v1187_v47  ;;  %v1103_v59 = vadd.f32 %v4086_v58, %v1025_v54 }
 0x284   : > { %v1459_v33 = vrot.slane %v1447_v10, 1  ;;  %v1189_v58 = vadd.f32 %v4099_v8, %v1103_v59  ;;  %v3221_v8 = vld [vmem:[%s4401_s5 + $0xe8] sm:$0xff]  ;;  %v3232_v59 = vld [vmem:[%s4401_s5 + $0x140] sm:$0xff] }
 0x286   : > { %v1461_v55 = vmax.f32 %v1447_v10, %v1459_v33  ;;  %v3218_v33 = vld [vmem:[%s4401_s5 + $0xd0] sm:$0xff] }
 0x287   : > { %v1335_v9 = vpop.f32.mrf.mxu2  ;;  %v1419_v12 = vpop.f32.mrf.mxu3 }
 0x288   : > { %v1462_v30 = vmax.f32 %v1457_v3, %v1461_v55  ;;  %v1436_v34 = vadd.f32 %v1419_v12, %v1350_v19  ;;  %v1351_v21 = vadd.f32 %v1335_v9, %v1273_v44  ;;  %v3225_v9 = vld [vmem:[%s4401_s5 + $0x108] sm:$0xff]  ;;  %v838_v12 = vadd.f32 %v4049_v16, %v4045_v39  ;;  %v3220_v19 = vld [vmem:[%s4401_s5 + $0xe0] sm:$0xff] }
 0x289   : > { %v1260_v40 = vpop.f32.mrf.mxu1  ;;  %v3224_v16 = vld [vmem:[%s4401_s5 + $0x100] sm:$0xff] }
 0x28a   : > { %v1464_v7 = vmul.f32 1.442695, %v1462_v30  ;;  %v1448_v51 = vadd.f32 %v4125_v56, %v1436_v34  ;;  %vm1463_vm3 = vcmp.gt.f32.partialorder %v1462_v30, 0.0  ;;  %v1274_v13 = vadd.f32 %v1260_v40, %v4088_v49  ;;  %v3227_v49 = vld [vmem:[%s4401_s5 + $0x118] sm:$0xff] }
 0x28c   : > { %3308 = vpow2.f32 %v1464_v7  ;;  %v1672_v42 = vrot.slane %v1448_v51, 1  ;;  %v941_v7 = vadd.f32 %v4051_v50, %v838_v12  ;;  %v3235_v50 = vld [vmem:[%s4401_s5 + $0x158] sm:$0xff]  ;;  %v3249_v12 = vld [vmem:[%s4401_s5 + $0x1c8] sm:$0xff] }
 0x28e   : > { %v1674_v4 = vmax.f32 %v1448_v51, %v1672_v42  ;;  %v1027_v17 = vadd.f32 %v4101_v26, %v941_v7  ;;  %v3231_v26 = vld [vmem:[%s4401_s5 + $0x138] sm:$0xff]  ;;  %v3244_v7 = vld [vmem:[%s4401_s5 + $0x1a0] sm:$0xff] }
 0x28f   : > { %v1338_v0 = vpop.f32.mrf.mxu2  ;;  %v1421_v53 = vpop.f32.mrf.mxu3 }
 0x290   : > { %v1437_v43 = vadd.f32 %v1421_v53, %v1351_v21  ;;  %v1352_v35 = vadd.f32 %v1338_v0, %v1274_v13  ;;  %v1105_v53 = vadd.f32 %v4103_v1, %v1027_v17  ;;  %v3239_v1 = vld [vmem:[%s4401_s5 + $0x178] sm:$0xff] }
 0x291   : > { %v1262_v31 = vpop.f32.mrf.mxu1 }
 0x292   : > { %v3309_v32 = vpop.eup %3308  ;;  %v1449_v52 = vadd.f32 %v4125_v56, %v1437_v43  ;;  %v1275_v5 = vadd.f32 %v1262_v31, %v1189_v58  ;;  %v3230_v31 = vld [vmem:[%s4401_s5 + $0x130] sm:$0xff]  ;;  %v3236_v58 = vld [vmem:[%s4401_s5 + $0x160] sm:$0xff] }
 0x293   : > { %v2725_v24 = vadd.f32 -1.0, %v3309_v32 }
 0x294   : > { %v1676_v61 = vrot.slane %v1449_v52, 1 }
 0x295   : > { %v1467_v57 = vsel %vm1463_vm3, %v1462_v30, %v2725_v24  ;;  %v1191_v24 = vadd.f32 %v4107_v38, %v1105_v53  ;;  %v3233_v38 = vld [vmem:[%s4401_s5 + $0x148] sm:$0xff] }
 0x296   : > { %v4184_v29 = vpack.c.bf16 %v1467_v57, %v1467_v57  ;;  %v1678_v36 = vmax.f32 %v1449_v52, %v1676_v61 }
 0x297   : > { %v1340_v25 = vpop.f32.mrf.mxu2  ;;  %v1424_v48 = vpop.f32.mrf.mxu3 }
 0x298   : > { %v1679_v45 = vmax.f32 %v1674_v4, %v1678_v36  ;;  %2767 = vmatmul.msk.bf16.vlgmr.msrb.gmra.mxu2 %vm1512_vm4, %v4184_v29  ;;  %v1487_v60 = vrot.slane %v4184_v29, 1  ;;  %v1578_v10 = vrot.slane %v4184_v29, 2  ;;  %v1438_v62 = vadd.f32 %v1424_v48, %v1352_v35 }
 0x299   : > { %1880 = vmatpush.bf16.msrb.mxu2 %v3223_v18  ;;  %v1353_v3 = vadd.f32 %v1340_v25, %v1275_v5  ;;  %v1265_v55 = vpop.f32.mrf.mxu1  ;;  %v1629_v42 = vrot.slane %v4184_v29, 3  ;;  %v3238_v29 = vld [vmem:[%s4401_s5 + $0x170] sm:$0xff]  ;;  %v3229_v25 = vld [vmem:[%s4401_s5 + $0x128] sm:$0xff] }
 0x29a   : > { %v1681_v22 = vmul.f32 1.442695, %v1679_v45  ;;  %2750 = vmatmul.msk.bf16.vlgmr.msra.gmra.mxu1 %vm1512_vm4, %v1487_v60  ;;  %2792 = vmatmul.msk.bf16.vlgmr.msrb.gmra.mxu3 %vm1512_vm4, %v1578_v10  ;;  %v1450_v15 = vadd.f32 %v4125_v56, %v1438_v62  ;;  %vm1680_vm5 = vcmp.gt.f32.partialorder %v1679_v45, 0.0  ;;  %v1276_v51 = vadd.f32 %v1265_v55, %v4105_v14  ;;  %v3228_v10 = vld [vmem:[%s4401_s5 + $0x120] sm:$0xff] }
 0x29b   : > { %1829 = vmatpush.bf16.msra.mxu1 %v3219_v23  ;;  %1945 = vmatpush.bf16.msrb.mxu3 %v3227_v49  ;;  %v3237_v23 = vld [vmem:[%s4401_s5 + $0x168] sm:$0xff] }
 0x29c   : > { %3310 = vpow2.f32 %v1681_v22  ;;  %v1891_v46 = vrot.slane %v1450_v15, 1  ;;  %v3251_v22 = vld [vmem:[%s4401_s5 + $0x1d8] sm:$0xff] }
 0x29d   : > { %1881 = vmatpush.bf16.msrb.mxu2 %v3222_v20 }
 0x29e   : > { %v1893_v21 = vmax.f32 %v1450_v15, %v1891_v46  ;;  %v3255_v15 = vld [vmem:[%s4401_s5 + $0x1f8] sm:$0xff] }
 0x29f   : > { %v1426_v37 = vpop.f32.mrf.mxu3  ;;  %1830 = vmatpush.bf16.msra.mxu1 %v3218_v33  ;;  %1946 = vmatpush.bf16.msrb.mxu3 %v3226_v6  ;;  %v1343_v27 = vpop.f32.mrf.mxu2  ;;  %v3247_v6 = vld [vmem:[%s4401_s5 + $0x1b8] sm:$0xff] }
 0x2a0   : > { %v1439_v41 = vadd.f32 %v1426_v37, %v1353_v3  ;;  %v1354_v2 = vadd.f32 %v1343_v27, %v1276_v51  ;;  %v3250_v37 = vld [vmem:[%s4401_s5 + $0x1d0] sm:$0xff]  ;;  %v3245_v27 = vld [vmem:[%s4401_s5 + $0x1a8] sm:$0xff] }
 0x2a1   : > { %1882 = vmatpush.bf16.msrb.mxu2 %v3221_v8  ;;  %v1267_v14 = vpop.f32.mrf.mxu1 }
 0x2a2   : > { %v3311_v30 = vpop.eup %3310  ;;  %v1451_v47 = vadd.f32 %v4125_v56, %v1439_v41  ;;  %v1277_v18 = vadd.f32 %v1267_v14, %v1191_v24  ;;  %v3246_v41 = vld [vmem:[%s4401_s5 + $0x1b0] sm:$0xff]  ;;  %v3263_v14 = vld [vmem:[%s4403_s7 + $0x38] sm:$0xff] }
 0x2a3   : > { %v2818_v34 = vadd.f32 -1.0, %v3311_v30  ;;  %1831 = vmatpush.bf16.msra.mxu1 %v3217_v63  ;;  %1947 = vmatpush.bf16.msrb.mxu3 %v3225_v9  ;;  %v3254_v9 = vld [vmem:[%s4401_s5 + $0x1f0] sm:$0xff]  ;;  %v3248_v30 = vld [vmem:[%s4401_s5 + $0x1c0] sm:$0xff] }
 0x2a4   : > { %v1895_v39 = vrot.slane %v1451_v47, 1  ;;  %2401 = vmatpush.bf16.msra.mxu0 %v3263_v14 }
 0x2a5   : > { %v1684_v40 = vsel %vm1680_vm5, %v1679_v45, %v2818_v34  ;;  %1883 = vmatpush.bf16.msrb.mxu2 %v3220_v19  ;;  %v3253_v19 = vld [vmem:[%s4401_s5 + $0x1e8] sm:$0xff] }
 0x2a6   : > { %v4237_v44 = vpack.c.bf16 %v1684_v40, %v1684_v40  ;;  %v1897_v0 = vmax.f32 %v1451_v47, %v1895_v39 }
 0x2a7   : > { %v1429_v43 = vpop.f32.mrf.mxu3  ;;  %1832 = vmatpush.bf16.msra.mxu1 %v3216_v28  ;;  %1948 = vmatpush.bf16.msrb.mxu3 %v3224_v16  ;;  %v1345_v57 = vpop.f32.mrf.mxu2  ;;  %v3252_v28 = vld [vmem:[%s4401_s5 + $0x1e0] sm:$0xff] }
 0x2a8   : > { %v1898_v32 = vmax.f32 %v1893_v21, %v1897_v0  ;;  %2843 = vmatmul.msk.bf16.vlgmr.msra.gmra.mxu2 %vm1512_vm4, %v4237_v44  ;;  %v1746_v52 = vrot.slane %v4237_v44, 1  ;;  %v1440_v54 = vadd.f32 %v1429_v43, %v1354_v2  ;;  %v1355_v4 = vadd.f32 %v1345_v57, %v1277_v18 }
 0x2a9   : > { %2048 = vmatpush.bf16.msra.mxu2 %v3235_v50  ;;  %v1848_v5 = vrot.slane %v4237_v44, 3  ;;  %v1797_v3 = vrot.slane %v4237_v44, 2 }
 0x2aa   : > { %v1900_v61 = vmul.f32 1.442695, %v1898_v32  ;;  %2817 = vmatmul.msk.bf16.vlgmr.msrb.gmra.mxu1 %vm1512_vm4, %v1629_v42  ;;  %2868 = vmatmul.msk.bf16.vlgmr.msra.gmra.mxu3 %vm1512_vm4, %v1746_v52  ;;  %v1452_v13 = vadd.f32 %v4125_v56, %v1440_v54  ;;  %vm1899_vm6 = vcmp.gt.f32.partialorder %v1898_v32, 0.0 }
 0x2ab   : > { %1997 = vmatpush.bf16.msrb.mxu1 %v3231_v26  ;;  %2099 = vmatpush.bf16.msra.mxu3 %v3239_v1 }
 0x2ac   : > { %3312 = vpow2.f32 %v1900_v61  ;;  %v2110_v45 = vrot.slane %v1452_v13, 1  ;;  %v3262_v61 = vld [vmem:[%s4403_s7 + $0x30] sm:$0xff] }
 0x2ad   : > { %2049 = vmatpush.bf16.msra.mxu2 %v3234_v11  ;;  %2402 = vmatpush.bf16.msra.mxu0 %v3262_v61 }
 0x2af   : > { %v1431_v36 = vpop.f32.mrf.mxu3  ;;  %1998 = vmatpush.bf16.msrb.mxu1 %v3230_v31  ;;  %2100 = vmatpush.bf16.msra.mxu3 %v3238_v29  ;;  %v3261_v31 = vld [vmem:[%s4403_s7 + $0x28] sm:$0xff] }
 0x2b0   : > { %v1441_v48 = vadd.f32 %v1431_v36, %v1355_v4 }
 0x2b1   : > { %2050 = vmatpush.bf16.msra.mxu2 %v3233_v38  ;;  %2403 = vmatpush.bf16.msra.mxu0 %v3261_v31 }
 0x2b2   : > { %v3313_v35 = vpop.eup %3312  ;;  %v1453_v60 = vadd.f32 %v4125_v56, %v1441_v48  ;;  %v2112_v56 = vmax.f32 %v1452_v13, %v2110_v45 }
 0x2b3   : > { %v2919_v49 = vadd.f32 -1.0, %v3313_v35  ;;  %1999 = vmatpush.bf16.msrb.mxu1 %v3229_v25  ;;  %2101 = vmatpush.bf16.msra.mxu3 %v3237_v23  ;;  %v3260_v25 = vld [vmem:[%s4403_s7 + $0x20] sm:$0xff] }
 0x2b4   : > { %v2114_v20 = vrot.slane %v1453_v60, 1 }
 0x2b5   : > { %2051 = vmatpush.bf16.msra.mxu2 %v3232_v59  ;;  %v1903_v62 = vsel %vm1899_vm6, %v1898_v32, %v2919_v49  ;;  %2404 = vmatpush.bf16.msra.mxu0 %v3260_v25  ;;  %v3259_v59 = vld [vmem:[%s4403_s7 + $0x18] sm:$0xff] }
 0x2b6   : > { %v2116_v33 = vmax.f32 %v1453_v60, %v2114_v20  ;;  %v1904_v55 = vpack.c.bf16 %v1903_v62, %v1903_v62  ;;  %v3258_v20 = vld [vmem:[%s4403_s7 + $0x10] sm:$0xff]  ;;  %v3257_v62 = vld [vmem:[%s4403_s7 + $0x8] sm:$0xff] }
 0x2b7   : > { %2000 = vmatpush.bf16.msrb.mxu1 %v3228_v10  ;;  %2102 = vmatpush.bf16.msra.mxu3 %v3236_v58 }
 0x2b8   : > { %v2117_v8 = vmax.f32 %v2112_v56, %v2116_v33  ;;  %2918 = vmatmul.msk.bf16.vlgmr.msrb.gmra.mxu2 %vm1512_vm4, %v1848_v5  ;;  %v2016_v16 = vrot.slane %v1904_v55, 2  ;;  %v1965_v17 = vrot.slane %v1904_v55, 1  ;;  %v2067_v40 = vrot.slane %v1904_v55, 3 }
 0x2b9   : > { %2267 = vmatpush.bf16.msrb.mxu2 %v3251_v22  ;;  %2405 = vmatpush.bf16.msra.mxu0 %v3259_v59 }
 0x2ba   : > { %v2119_v63 = vmul.f32 1.442695, %v2117_v8  ;;  %2893 = vmatmul.msk.bf16.vlgmr.msra.gmra.mxu1 %vm1512_vm4, %v1797_v3  ;;  %2944 = vmatmul.msk.bf16.vlgmr.msrb.gmra.mxu3 %vm1512_vm4, %v1904_v55  ;;  %vm2118_vm7 = vcmp.gt.f32.partialorder %v2117_v8, 0.0 }
 0x2bb   : > { %2216 = vmatpush.bf16.msra.mxu1 %v3247_v6  ;;  %2318 = vmatpush.bf16.msrb.mxu3 %v3255_v15 }
 0x2bc   : > { %3314 = vpow2.f32 %v2119_v63 }
 0x2bd   : > { %2268 = vmatpush.bf16.msrb.mxu2 %v3250_v37  ;;  %2406 = vmatpush.bf16.msra.mxu0 %v3258_v20 }
 0x2bf   : > { %2217 = vmatpush.bf16.msra.mxu1 %v3246_v41  ;;  %2319 = vmatpush.bf16.msrb.mxu3 %v3254_v9 }
 0x2c1   : > { %2269 = vmatpush.bf16.msrb.mxu2 %v3249_v12  ;;  %2407 = vmatpush.bf16.msra.mxu0 %v3257_v62 }
 0x2c2   : > { %v3315_v46 = vpop.eup %3314 }
 0x2c3   : > { %v3020_v47 = vadd.f32 -1.0, %v3315_v46  ;;  %2218 = vmatpush.bf16.msra.mxu1 %v3245_v27  ;;  %2320 = vmatpush.bf16.msrb.mxu3 %v3253_v19 }
 0x2c5   : > { %v2122_v34 = vsel %vm2118_vm7, %v2117_v8, %v3020_v47  ;;  %2270 = vmatpush.bf16.msrb.mxu2 %v3248_v30  ;;  %v3256_v8 = vld [vmem:[%s4403_s7] sm:$0xff] }
 0x2c6   : > { %v2123_v39 = vpack.c.bf16 %v2122_v34, %v2122_v34  ;;  %2408 = vmatpush.bf16.msra.mxu0 %v3256_v8  ;;  %v2328_v30 = vld [vmem:[%s4402_s6] sm:$0x1] }
 0x2c7   : > { %2219 = vmatpush.bf16.msra.mxu1 %v3244_v7  ;;  %2321 = vmatpush.bf16.msrb.mxu3 %v3252_v28 }
 0x2c8   : > { %2994 = vmatmul.msk.bf16.vlgmr.msra.gmra.mxu2 %vm1512_vm4, %v2016_v16  ;;  %3045 = vmatmul.msk.bf16.vlgmr.msrb.gmra.mxu0 %vm1512_vm4, %v2123_v39  ;;  %v2235_v50 = vrot.slane %v2123_v39, 2  ;;  %v2184_v44 = vrot.slane %v2123_v39, 1  ;;  %v2286_v21 = vrot.slane %v2123_v39, 3 }
 0x2ca   : > { %2969 = vmatmul.msk.bf16.vlgmr.msrb.gmra.mxu1 %vm1512_vm4, %v1965_v17  ;;  %3019 = vmatmul.msk.bf16.vlgmr.msra.gmra.mxu3 %vm1512_vm4, %v2067_v40 }
 0x2d8   : > { %3095 = vmatmul.msk.bf16.vlgmr.msrb.gmra.mxu2 %vm1512_vm4, %v2235_v50 }
 0x2da   : > { %3070 = vmatmul.msk.bf16.vlgmr.msra.gmra.mxu1 %vm1512_vm4, %v2184_v44  ;;  %3120 = vmatmul.msk.bf16.vlgmr.msrb.gmra.mxu3 %vm1512_vm4, %v2286_v21  ;;  %v2352_v44 = vld [vmem:[%s4404_s8] sm:$0x1] }
 0x317   : > { %v1525_v51 = vpop.f32.mrf.mxu1 }
 0x31b   : > { %v1565_v0 = vpop.f32.mrf.mxu2 }
 0x31c   : > { %v1566_v57 = vadd.f32 %v1565_v0, %v1525_v51 }
 0x31d   : > { %v1615_v53 = vpop.f32.mrf.mxu3 }
 0x31e   : > { %v1619_v29 = vadd.f32 %v1615_v53, %v1566_v57 }
 0x31f   : > { %v1527_v43 = vpop.f32.mrf.mxu1 }
 0x323   : > { %v1567_v26 = vpop.f32.mrf.mxu2 }
 0x325   : > { %v1617_v2 = vpop.f32.mrf.mxu3 }
 0x327   : > { %v1666_v32 = vpop.f32.mrf.mxu1 }
 0x328   : > { %v1670_v38 = vadd.f32 %v1666_v32, %v1619_v29 }
 0x32b   : > { %v1731_v42 = vpop.f32.mrf.mxu2 }
 0x32c   : > { %v1735_v36 = vadd.f32 %v1731_v42, %v1670_v38 }
 0x32d   : > { %v1783_v52 = vpop.f32.mrf.mxu3 }
 0x32e   : > { %v1787_v23 = vadd.f32 %v1783_v52, %v1735_v36 }
 0x32f   : > { %v1668_v1 = vpop.f32.mrf.mxu1 }
 0x333   : > { %v1733_v11 = vpop.f32.mrf.mxu2 }
 0x335   : > { %v1785_v24 = vpop.f32.mrf.mxu3 }
 0x337   : > { %v1834_v54 = vpop.f32.mrf.mxu1 }
 0x338   : > { %v1838_v45 = vadd.f32 %v1834_v54, %v1787_v23 }
 0x33b   : > { %v1885_v18 = vpop.f32.mrf.mxu2 }
 0x33c   : > { %v1889_v10 = vadd.f32 %v1885_v18, %v1838_v45 }
 0x33d   : > { %v1950_v4 = vpop.f32.mrf.mxu3 }
 0x33e   : > { %v1954_v22 = vadd.f32 %v1950_v4, %v1889_v10 }
 0x33f   : > { %v1836_v13 = vpop.f32.mrf.mxu1 }
 0x343   : > { %v1887_v48 = vpop.f32.mrf.mxu2 }
 0x345   : > { %v2169_v35 = vpop.f32.mrf.mxu0  ;;  %v1952_v60 = vpop.f32.mrf.mxu3 }
 0x347   : > { %v2002_v49 = vpop.f32.mrf.mxu1 }
 0x348   : > { %v2006_v33 = vadd.f32 %v2002_v49, %v1954_v22 }
 0x34b   : > { %v2053_v58 = vpop.f32.mrf.mxu2 }
 0x34c   : > { %v2057_v3 = vadd.f32 %v2053_v58, %v2006_v33 }
 0x34d   : > { %v2171_v56 = vpop.f32.mrf.mxu0  ;;  %v2104_v5 = vpop.f32.mrf.mxu3 }
 0x34e   : > { %v2108_v55 = vadd.f32 %v2104_v5, %v2057_v3 }
 0x34f   : > { %v2004_v6 = vpop.f32.mrf.mxu1 }
 0x350   : > { %v2173_v41 = vadd.f32 %v2169_v35, %v2108_v55 }
 0x353   : > { %v2055_v15 = vpop.f32.mrf.mxu2 }
 0x355   : > { %v2106_v37 = vpop.f32.mrf.mxu3 }
 0x357   : > { %v2221_v63 = vpop.f32.mrf.mxu1 }
 0x358   : > { %v2225_v9 = vadd.f32 %v2221_v63, %v2173_v41 }
 0x35b   : > { %v2272_v12 = vpop.f32.mrf.mxu2 }
 0x35c   : > { %v2276_v27 = vadd.f32 %v2272_v12, %v2225_v9 }
 0x35d   : > { %v2323_v19 = vpop.f32.mrf.mxu3 }
 0x35e   : > { %v2327_v46 = vadd.f32 %v2323_v19, %v2276_v27 }
 0x35f   : > { %v2223_v47 = vpop.f32.mrf.mxu1 }
 0x360   : > { %v2329_v7 = vadd.f32 %v2328_v30, %v2327_v46 }
 0x362   : > { %v2331_v34 = vmul.f32 1.442695, %v2329_v7  ;;  %vm2330_vm8 = vcmp.gt.f32.partialorder %v2329_v7, 0.0 }
 0x363   : > { %v2274_v28 = vpop.f32.mrf.mxu2 }
 0x364   : > { %3316 = vpow2.f32 %v2331_v34 }
 0x365   : > { %v2325_v39 = vpop.f32.mrf.mxu3 }
 0x36a   : > { %v3317_v16 = vpop.eup %3316 }
 0x36b   : > { %v3121_v17 = vadd.f32 -1.0, %v3317_v16 }
 0x36d   : > { %v2334_v40 = vsel %vm2330_vm8, %v2329_v7, %v3121_v17 }
 0x36e   : > { %v2335_v50 = vpack.c.bf16 %v2334_v40, %v2334_v40 }
 0x370   : > { %2409 = vmatmul.bf16.vlgmr.msra.gmra.mxu0 %v2335_v50 }
 0x3ed   : > { %v2410_v21 = vpop.f32.mrf.mxu0 }
 0x3ee   : > { %v2411_v51 = vadd.f32 %v2410_v21, %v2352_v44 }
 0x3f0   : > { %v2415_v0 = vsel %vm2414_vm9, %v2411_v51, -inf }
 0x3f1   : > { %2416 = vmax.xlane.f32.xlu0 %v2415_v0 }
 0x3f5   : > { %v2412_v53 = vpop.f32.mrf.mxu0 }
 0x464   : > { %v2417_v43 = vpop.xlane.xlu0 %2416 }
 0x465   : > { %v2418_v26 = vsub.f32 %v2411_v51, %v2417_v43 }
 0x467   : > { %v2419_v2 = vmul.f32 1.442695, %v2418_v26 }
 0x469   : > { %3318 = vpow2.f32 %v2419_v2 }
 0x46f   : > { %v3319_v32 = vpop.eup %3318 }
 0x470   : > { %v2421_v42 = vsel %vm2414_vm9, %v3319_v32, 0.0 }
 0x471   : > { %2422 = vadd.xlane.f32.xlu0 %v2421_v42 }
 0x4e4   : > { %v2423_v52 = vpop.xlane.xlu0 %2422 }
 0x4e5   : > { %3320 = vrcp.f32 %v2423_v52 }
 0x4eb   : > { %v3321_v1 = vpop.eup %3320 }
 0x4ec   : > { %v2425_v14 = vmul.f32 %v3321_v1, %v3319_v32 }
 0x4ee   : > { %2426 = vst.msk [vmem:[%s324_s14] sm:$0x1] %vm2414_vm9, %v2425_v14 }
 0x4ef   : > { %3349 = shalt.err (!%p3346_p3)
}
 0x4f0   : > { %3265 = dma.vmem_to_hbm [thread:$0]  (%p3476_p5), %s2439_s16, 16, %s2441_s17, %s2428_s21  }
 0x4f1 PF: > { %p3271_p4 = scmp.ge.s32.totalorder %s3384_s12, 2  ;;  %s2452_s26 = sand.u32 1, %s3372_s30  }
 0x4f2   : > { %s2453_s29 = scalar_lea.sflag [#allocation4], %s2452_s26 }
 0x4f3   : > { %p3268_p7 = pnand %p3271_p4, %p3480_p6 }
 0x4f5   : > { %p3269_p8 = pneg %p3268_p7 }
 0x4f7   : > { %3367 = dma.done.wait (%p3269_p8), %s2453_s29, 16  }
 0x4f8   : > { %3369 = vsyncadd (%p3269_p8), %s2453_s29, 4294967280  ;;  %p19_p9 = scmp.ge.s32.totalorder %s3463_s15, 4   ;;  %s4440_s30 = smov %s3376_s10 }
 0x4f9   : > { %s4441_s10 = smov %s3380_s11  ;;  %s4442_s11 = smov %s3474_s18 }
 0x4fa   : > { %s4443_s12 = smov %s3463_s15  ;;  %21 = sbr.rel (!%p19_p9) target bundleno = 3 (0x3), region = 114 }
 0x4ff   :  { %2458 = vsyncpa [#allocation4], 1 }
 0x500   :  { %2460 = vsyncpa [#allocation4 + $0x1], 1 }

</bundles_post_ra>
